<compile_context>
chip_gen: v7x
topology: tpu7x:2x2x1
jax: 0.10.0
libtpu: 0.0.40
codegen_flags: <defaults>
</compile_context>

<pallas_src>
import functools

import jax
import jax.numpy as jnp
import numpy as np
from jax import lax
from jax.experimental import pallas as pl
from jax.experimental.pallas import tpu as pltpu

NEG = -1e9        # stands in for the -inf action masks (same softmax semantics in f32)
OUT_LANES = 128   # lane-dense head output width


def _log_softmax(logits):
    m = jnp.max(logits, axis=-1, keepdims=True)
    z = logits - m
    return z - jnp.log(jnp.sum(jnp.exp(z), axis=-1, keepdims=True))


# -----------------------------------------------------------------------------
# Single fused kernel:
#   GraphEncoder (gnn_layers x GCNConv+ReLU, GraphAttentionPooling)
#   + ActorNet (two masked selections with known actions)
#   + CriticNet
# -----------------------------------------------------------------------------
def _fused_kernel(L, B, N, F,
                  a_ref, x0_ref, w0_ref, w_ref, b_ref, wpool_ref,
                  mask1_ref, mask2_ref, oh1_ref, oh2_ref,
                  wfa_ref, wq_ref, wfc_ref, scal_ref,
                  sfx_ref, sfg_ref, out_ref):
    # ---- GCN over all B graphs at once -------------------------------------
    # a_ref is the block-diagonal normalized adjacency (B*N, B*N); node features
    # are held flattened as (B*N, F) so the X @ W matmul uses all B*N rows and
    # the aggregation is one MXU push per layer.
    a = a_ref[...]                                          # (B*N, B*N)

    # layer 0: node_feature_dim == 1, so X0 @ W0 is an outer product (VPU only)
    h = x0_ref[...] * w0_ref[...]                           # (B*N,1)*(1,F) -> (B*N,F)
    h = jnp.dot(a, h, preferred_element_type=jnp.float32) + b_ref[0]
    x = jnp.maximum(h, 0.0)

    # layers 1 .. L-1 : A~ @ (X W_l) + b_l , ReLU (norm = Identity)
    for l in range(1, L):
        h = jnp.dot(x, w_ref[l - 1], preferred_element_type=jnp.float32)
        h = jnp.dot(a, h, preferred_element_type=jnp.float32) + b_ref[l]
        x = jnp.maximum(h, 0.0)

    x3 = x.reshape(B, N, F)                                 # tile-aligned (N % 8 == 0)

    # ---- GraphAttentionPooling (every graph has exactly N nodes) -----------
    mean = jnp.mean(x3, axis=1)                                            # (B, F)
    tg = jnp.tanh(jnp.dot(mean, wpool_ref[...],
                          preferred_element_type=jnp.float32))             # (B, F)
    coefs = jax.nn.sigmoid(jnp.sum(x3 * tg[:, None, :], axis=-1,
                                   keepdims=True) * 10.0)                  # (B, N, 1)
    gfeat = jnp.sum(coefs * x3, axis=1)                                    # (B, F)

    # state_feat = concat(node_feat, broadcast(graph_feat)) is emitted as two
    # pieces (no lane-axis concatenate in the kernel); wrapper reassembles.
    sfx_ref[...] = x3
    sfg_ref[...] = gfeat

    # ---- scalars (SMEM) -----------------------------------------------------
    bf_a = scal_ref[0]; wm_a = scal_ref[1]; bm_a = scal_ref[2]
    bf_c = scal_ref[3]; wm_c = scal_ref[4]; bm_c = scal_ref[5]

    # Head weights act on D = 2F = [node part | graph part]; use split halves so
    # the concatenated state_feat never has to be materialized.
    wfa_x = wfa_ref[:, :F]; wfa_g = wfa_ref[:, F:]          # (1, F) each
    wfc_x = wfc_ref[:, :F]; wfc_g = wfc_ref[:, F:]

    # ---- ActorNet selection 1: act1_resnet (ResNetBlock D -> 1) ------------
    s1 = (jnp.sum(x3 * wfa_x, axis=-1)
          + jnp.sum(gfeat * wfa_g, axis=-1, keepdims=True) + bf_a)         # (B, N)
    scores1 = jnp.maximum(jnp.maximum(s1, 0.0) * wm_a + bm_a, 0.0) + s1
    logp1 = _log_softmax(scores1 + mask1_ref[...])                         # (B, N)
    p1 = jnp.exp(logp1)
    oh1 = oh1_ref[...]
    lp1 = jnp.sum(oh1 * logp1, axis=-1, keepdims=True)                     # (B, 1)
    ent1 = -jnp.sum(p1 * logp1, axis=-1, keepdims=True)                    # (B, 1)

    # ---- ActorNet selection 2: query = tanh(act2_query(state_feat[act1])) --
    x_prev = jnp.sum(oh1[:, :, None] * x3, axis=1)                         # (B, F)
    q = jnp.tanh(jnp.dot(x_prev, wq_ref[:F, :], preferred_element_type=jnp.float32)
                 + jnp.dot(gfeat, wq_ref[F:, :], preferred_element_type=jnp.float32))
    q_x = q[:, :F]; q_g = q[:, F:]                                         # (B, F)
    scores2 = (jnp.sum(q_x[:, None, :] * x3, axis=-1)
               + jnp.sum(q_g * gfeat, axis=-1, keepdims=True))             # (B, N)
    logp2 = _log_softmax(scores2 + mask2_ref[...])
    p2 = jnp.exp(logp2)
    lp2 = jnp.sum(oh2_ref[...] * logp2, axis=-1, keepdims=True)
    ent2 = -jnp.sum(p2 * logp2, axis=-1, keepdims=True)

    # ---- CriticNet: max over nodes, then critic_resnet (D -> 1) ------------
    xmax = jnp.max(x3, axis=1)                                             # (B, F)
    c1 = (jnp.sum(xmax * wfc_x, axis=-1, keepdims=True)
          + jnp.sum(gfeat * wfc_g, axis=-1, keepdims=True) + bf_c)         # (B, 1)
    value = jnp.maximum(jnp.maximum(c1, 0.0) * wm_c + bm_c, 0.0) + c1

    # ---- lane-dense head output: (B, 128), lanes 0..3 carry the results ----
    lane = lax.broadcasted_iota(jnp.int32, (B, OUT_LANES), 1)
    slab = (jnp.where(lane == 0, lp1, 0.0)
            + jnp.where(lane == 1, lp2, 0.0)
            + jnp.where(lane == 2, ent1 + ent2, 0.0)
            + jnp.where(lane == 3, value, 0.0))
    out_ref[...] = slab


@jax.jit
def actor_critic_forward(a_hat, x0, w0, w_rest, b_stack, w_pool,
                         mask1, mask2, oh1, oh2, wfa, wq, wfc, scalars):
    B, N = x0.shape
    F = w0.shape[1]
    L = b_stack.shape[0]
    D = 2 * F
    BN = B * N

    # Shared per-graph adjacency -> block-diagonal so one matmul aggregates all
    # B graphs of the flattened (B*N, F) node-feature slab. (Built under jit,
    # fused with the rest of the prologue; trivial at these sizes.)
    a_big = jnp.kron(jnp.eye(B, dtype=jnp.float32), a_hat)        # (B*N, B*N)
    x0_col = x0.reshape(BN, 1)

    kernel = functools.partial(_fused_kernel, L, B, N, F)
    full2 = lambda i: (0, 0)
    full3 = lambda i: (0, 0, 0)

    sf_x, sf_g, head = pl.pallas_call(
        kernel,
        out_shape=(jax.ShapeDtypeStruct((B, N, F), jnp.float32),
                   jax.ShapeDtypeStruct((B, F), jnp.float32),
                   jax.ShapeDtypeStruct((B, OUT_LANES), jnp.float32)),
        grid=(1,),
        in_specs=[
            pl.BlockSpec((BN, BN), full2),            # a_big
            pl.BlockSpec((BN, 1), full2),             # x0 column
            pl.BlockSpec((1, F), full2),              # layer-0 weight (1 -> F)
            pl.BlockSpec((L - 1, F, F), full3),       # layers 1..L-1 weights
            pl.BlockSpec((L, 1, F), full3),           # biases
            pl.BlockSpec((F, F), full2),              # GraphAttentionPooling weight
            pl.BlockSpec((B, N), full2),              # mask1
            pl.BlockSpec((B, N), full2),              # mask2
            pl.BlockSpec((B, N), full2),              # one-hot act1
            pl.BlockSpec((B, N), full2),              # one-hot act2
            pl.BlockSpec((1, D), full2),              # act1_resnet first_linear
            pl.BlockSpec((D, D), full2),              # act2_query
            pl.BlockSpec((1, D), full2),              # critic first_linear
            pl.BlockSpec(memory_space=pltpu.MemorySpace.SMEM),   # 6 scalars
        ],
        out_specs=(
            pl.BlockSpec((B, N, F), full3),
            pl.BlockSpec((B, F), full2),
            pl.BlockSpec((B, OUT_LANES), full2),
        ),
        compiler_params=pltpu.CompilerParams(dimension_semantics=("arbitrary",)),
    )(a_big, x0_col, w0, w_rest, b_stack, w_pool,
      mask1, mask2, oh1, oh2, wfa, wq, wfc, scalars)

    # Reassemble state_feat = concat(node_feat, broadcast(graph_feat)) outside
    # the kernel (validation only; the heads consumed the pieces in-kernel).
    state_feat = jnp.concatenate(
        [sf_x, jnp.broadcast_to(sf_g[:, None, :], (B, N, F))], axis=-1)
    return state_feat, head[:, :4]


# -----------------------------------------------------------------------------
# Pure-JAX reference (same math) for a correctness check.
# -----------------------------------------------------------------------------
def reference_forward(a_hat, x0, w0, w_rest, b_stack, w_pool,
                      mask1, mask2, oh1, oh2, wfa, wq, wfc, scal):
    L = b_stack.shape[0]
    x = x0[:, :, None] * w0[None]                                  # (B, N, F)
    x = jnp.maximum(jnp.einsum('ij,bjf->bif', a_hat, x) + b_stack[0][None], 0.0)
    for l in range(1, L):
        h = jnp.einsum('ij,bjf->bif', a_hat, x @ w_rest[l - 1]) + b_stack[l][None]
        x = jnp.maximum(h, 0.0)
    mean = x.mean(axis=1)
    tg = jnp.tanh(mean @ w_pool)
    coefs = jax.nn.sigmoid(jnp.sum(x * tg[:, None, :], axis=-1) * 10.0)
    gfeat = jnp.sum(coefs[..., None] * x, axis=1)
    sf = jnp.concatenate([x, jnp.broadcast_to(gfeat[:, None, :], x.shape)], axis=-1)

    bf_a, wm_a, bm_a, bf_c, wm_c, bm_c = (scal[i] for i in range(6))
    s1 = jnp.sum(sf * wfa[0], axis=-1) + bf_a
    scores1 = jnp.maximum(jnp.maximum(s1, 0.0) * wm_a + bm_a, 0.0) + s1
    logp1 = jax.nn.log_softmax(scores1 + mask1, axis=-1)
    p1 = jnp.exp(logp1)
    lp1 = jnp.sum(oh1 * logp1, axis=-1)
    ent1 = -jnp.sum(p1 * logp1, axis=-1)

    prev = jnp.sum(oh1[:, :, None] * sf, axis=1)
    q = jnp.tanh(prev @ wq)
    scores2 = jnp.sum(q[:, None, :] * sf, axis=-1)
    logp2 = jax.nn.log_softmax(scores2 + mask2, axis=-1)
    p2 = jnp.exp(logp2)
    lp2 = jnp.sum(oh2 * logp2, axis=-1)
    ent2 = -jnp.sum(p2 * logp2, axis=-1)

    sfmax = jnp.max(sf, axis=1)
    c1 = jnp.sum(sfmax * wfc[0], axis=-1) + bf_c
    value = jnp.maximum(jnp.maximum(c1, 0.0) * wm_c + bm_c, 0.0) + c1
    return sf, jnp.stack([lp1, lp2, ent1 + ent2, value], axis=1)


if __name__ == "__main__":
    B, N, F, L = 2, 16, 32, 3          # batch, nodes/graph, node_output_size, gnn_layers
    D = 2 * F                          # state_feature_size = node_output_size * 2
    key = jax.random.PRNGKey(0)
    keys = jax.random.split(key, 8)

    # inp_lower_matrix: strictly-lower-triangular edge weights (the nested-list
    # argument of ActorCritic.evaluate), held as a dense [B, N, N] array.
    w_lower = jax.random.uniform(keys[0], (B, N, N), dtype=jnp.float32)
    w_lower = w_lower * jnp.tril(jnp.ones((N, N), jnp.float32), k=-1)

    # matrix_list_to_graphs: x[node] = 1 + sum of incident edge weights.
    # (edge_attrs are stored but never consumed by GCNConv in this model.)
    x0 = 1.0 + w_lower.sum(axis=2) + w_lower.sum(axis=1)                 # (B, N)

    # GCNConv normalized adjacency: edge (row->col) for col<row, + self-loops,
    # symmetric D^-1/2 (A+I) D^-1/2 (PyG gcn_norm); identical for every batch.
    a_plus = jnp.triu(jnp.ones((N, N), jnp.float32), k=1) + jnp.eye(N, dtype=jnp.float32)
    deg = a_plus.sum(axis=1)
    dinv = 1.0 / jnp.sqrt(deg)
    a_hat = dinv[:, None] * a_plus * dinv[None, :]

    # Deterministic synthetic parameters.
    scale = 1.0 / jnp.sqrt(jnp.float32(F))
    w0 = jax.random.normal(keys[1], (1, F), jnp.float32) * 0.5           # layer-0: 1 -> F
    w_rest = jax.random.normal(keys[2], (L - 1, F, F), jnp.float32) * scale
    b_stack = jax.random.normal(keys[3], (L, 1, F), jnp.float32) * 0.1
    w_pool = jax.random.normal(keys[4], (F, F), jnp.float32) * scale     # GraphAttentionPooling

    wfa = jax.random.normal(keys[5], (1, D), jnp.float32) / jnp.sqrt(jnp.float32(D))  # act1_resnet first_linear
    wq = jax.random.normal(keys[6], (D, D), jnp.float32) / jnp.sqrt(jnp.float32(D))   # act2_query
    wfc = jax.random.normal(keys[7], (1, D), jnp.float32) / jnp.sqrt(jnp.float32(D))  # critic first_linear
    # [bias_first_a, w_mid_a, bias_mid_a, bias_first_c, w_mid_c, bias_mid_c]
    scalars = jnp.array([0.1, 0.7, -0.05, -0.2, 0.5, 0.3], jnp.float32)

    # edge_candidates (host-side dict structures) -> masks; known actions
    # (the `evaluate` path uses given actions, no sampling).
    edge_candidates = []
    for b in range(B):
        cand = {}
        for n in range(N):
            cand[n] = [(n + 1) % N, (n + 3) % N] if n % 2 == 0 else []
        edge_candidates.append(cand)
    mask1_np = np.full((B, N), NEG, np.float32)
    mask2_np = np.full((B, N), NEG, np.float32)
    act1 = np.array([(2 * b) % N for b in range(B)], np.int32)
    act2 = np.zeros((B,), np.int32)
    for b in range(B):
        for n, c in edge_candidates[b].items():
            if len(c) > 0:
                mask1_np[b, n] = 0.0
        cands = edge_candidates[b][int(act1[b])]
        for idx in cands:
            mask2_np[b, idx] = 0.0
        act2[b] = cands[0]
    mask1 = jnp.asarray(mask1_np)
    mask2 = jnp.asarray(mask2_np)
    oh1 = jax.nn.one_hot(act1, N, dtype=jnp.float32)
    oh2 = jax.nn.one_hot(act2, N, dtype=jnp.float32)

    # ---- run the single fused (jitted) Pallas kernel ----
    state_feat, out = actor_critic_forward(a_hat, x0, w0, w_rest, b_stack, w_pool,
                                           mask1, mask2, oh1, oh2,
                                           wfa, wq, wfc, scalars)
    out = jax.block_until_ready(out)

    action_logits = jnp.stack([out[:, 0], out[:, 1]], axis=0)             # [2, B]
    entropy = out[:, 2]                                                   # [B]
    state_value = out[:, 3]                                               # [B]

    # correctness check against a pure-JAX reference
    sf_ref, out_ref_vals = reference_forward(a_hat, x0, w0, w_rest, b_stack, w_pool,
                                             mask1, mask2, oh1, oh2, wfa, wq, wfc,
                                             scalars)
    assert np.allclose(np.asarray(state_feat), np.asarray(sf_ref), rtol=2e-3, atol=2e-3)
    assert np.allclose(np.asarray(out), np.asarray(out_ref_vals), rtol=2e-3, atol=2e-3)
    assert action_logits.shape == (2, B) and state_value.shape == (B,) and entropy.shape == (B,)

    # TODO(synk): Categorical *sampling* in ActorCritic.act() and the Python
    # dict/list graph & memory bookkeeping stay on the host (no Pallas equivalent).
    print("KERNEL_OK")
</pallas_src>

<mosaic_0001>
module attributes {stable_mosaic.version = 11 : i64} {
  func.func @_fused_kernel(%arg0: i32, %arg1: memref<32x32xf32, #tpu.memory_space<vmem>>, %arg2: memref<32x1xf32, #tpu.memory_space<vmem>>, %arg3: memref<1x32xf32, #tpu.memory_space<vmem>>, %arg4: memref<2x32x32xf32, #tpu.memory_space<vmem>>, %arg5: memref<3x1x32xf32, #tpu.memory_space<vmem>>, %arg6: memref<32x32xf32, #tpu.memory_space<vmem>>, %arg7: memref<2x16xf32, #tpu.memory_space<vmem>>, %arg8: memref<2x16xf32, #tpu.memory_space<vmem>>, %arg9: memref<2x16xf32, #tpu.memory_space<vmem>>, %arg10: memref<2x16xf32, #tpu.memory_space<vmem>>, %arg11: memref<1x64xf32, #tpu.memory_space<vmem>>, %arg12: memref<64x64xf32, #tpu.memory_space<vmem>>, %arg13: memref<1x64xf32, #tpu.memory_space<vmem>>, %arg14: memref<6xf32, #tpu.memory_space<smem>>, %arg15: memref<2x16x32xf32, #tpu.memory_space<vmem>>, %arg16: memref<2x32xf32, #tpu.memory_space<vmem>>, %arg17: memref<2x128xf32, #tpu.memory_space<vmem>>) attributes {dimension_semantics = [#tpu.dimension_semantics<arbitrary>], iteration_bounds = array<i64: 1>, scalar_prefetch = 0 : i64, scratch_operands = 0 : i64, tpu.core_type = #tpu.core_type<tc>, window_params = [{pipeline_mode = #tpu.pipeline_mode<synchronous>, transform_indices = @transform_0, window_bounds = array<i64: 32, 32>}, {pipeline_mode = #tpu.pipeline_mode<synchronous>, transform_indices = @transform_1, window_bounds = array<i64: 32, 1>}, {pipeline_mode = #tpu.pipeline_mode<synchronous>, transform_indices = @transform_2, window_bounds = array<i64: 1, 32>}, {pipeline_mode = #tpu.pipeline_mode<synchronous>, transform_indices = @transform_3, window_bounds = array<i64: 2, 32, 32>}, {pipeline_mode = #tpu.pipeline_mode<synchronous>, transform_indices = @transform_4, window_bounds = array<i64: 3, 1, 32>}, {pipeline_mode = #tpu.pipeline_mode<synchronous>, transform_indices = @transform_5, window_bounds = array<i64: 32, 32>}, {pipeline_mode = #tpu.pipeline_mode<synchronous>, transform_indices = @transform_6, window_bounds = array<i64: 2, 16>}, {pipeline_mode = #tpu.pipeline_mode<synchronous>, transform_indices = @transform_7, window_bounds = array<i64: 2, 16>}, {pipeline_mode = #tpu.pipeline_mode<synchronous>, transform_indices = @transform_8, window_bounds = array<i64: 2, 16>}, {pipeline_mode = #tpu.pipeline_mode<synchronous>, transform_indices = @transform_9, window_bounds = array<i64: 2, 16>}, {pipeline_mode = #tpu.pipeline_mode<synchronous>, transform_indices = @transform_10, window_bounds = array<i64: 1, 64>}, {pipeline_mode = #tpu.pipeline_mode<synchronous>, transform_indices = @transform_11, window_bounds = array<i64: 64, 64>}, {pipeline_mode = #tpu.pipeline_mode<synchronous>, transform_indices = @transform_12, window_bounds = array<i64: 1, 64>}, {transform_indices = @transform_13, window_bounds = array<i64: 6>}, {pipeline_mode = #tpu.pipeline_mode<synchronous>, transform_indices = @transform_14, window_bounds = array<i64: 2, 16, 32>}, {pipeline_mode = #tpu.pipeline_mode<synchronous>, transform_indices = @transform_15, window_bounds = array<i64: 2, 32>}, {pipeline_mode = #tpu.pipeline_mode<synchronous>, transform_indices = @transform_16, window_bounds = array<i64: 2, 128>}]} {
    %c0 = arith.constant 0 : index
    %c0_0 = arith.constant 0 : index
    %0 = vector.load %arg1[%c0, %c0_0] : memref<32x32xf32, #tpu.memory_space<vmem>>, vector<32x32xf32>
    %c0_1 = arith.constant 0 : index
    %c0_2 = arith.constant 0 : index
    %1 = vector.load %arg2[%c0_1, %c0_2] : memref<32x1xf32, #tpu.memory_space<vmem>>, vector<32x1xf32>
    %c0_3 = arith.constant 0 : index
    %c0_4 = arith.constant 0 : index
    %2 = vector.load %arg3[%c0_3, %c0_4] : memref<1x32xf32, #tpu.memory_space<vmem>>, vector<1x32xf32>
    %3 = vector.broadcast %1 : vector<32x1xf32> to vector<32x32xf32>
    %4 = vector.broadcast %2 : vector<1x32xf32> to vector<32x32xf32>
    %5 = arith.mulf %3, %4 : vector<32x32xf32>
    %cst = arith.constant dense<0.000000e+00> : vector<32x32xf32>
    %6 = tpu.matmul %0, %5, %cst {dimension_numbers = #tpu.dot_dimension_numbers<[1], [0], [0], [1], [0, 0, 1, 1], [], []>} : vector<32x32xf32>, vector<32x32xf32>, vector<32x32xf32> -> vector<32x32xf32>
    %c0_5 = arith.constant 0 : index
    %c0_6 = arith.constant 0 : index
    %c0_7 = arith.constant 0 : index
    %7 = vector.load %arg5[%c0_5, %c0_6, %c0_7] : memref<3x1x32xf32, #tpu.memory_space<vmem>>, vector<1x1x32xf32>
    %8 = vector.shape_cast %7 : vector<1x1x32xf32> to vector<1x32xf32>
    %9 = vector.broadcast %8 : vector<1x32xf32> to vector<32x32xf32>
    %10 = arith.addf %6, %9 : vector<32x32xf32>
    %cst_8 = arith.constant 0.000000e+00 : f32
    %11 = vector.broadcast %cst_8 : f32 to vector<32x32xf32>
    %12 = arith.maximumf %10, %11 : vector<32x32xf32>
    %c0_9 = arith.constant 0 : index
    %c0_10 = arith.constant 0 : index
    %c0_11 = arith.constant 0 : index
    %13 = vector.load %arg4[%c0_9, %c0_10, %c0_11] : memref<2x32x32xf32, #tpu.memory_space<vmem>>, vector<1x32x32xf32>
    %14 = vector.shape_cast %13 : vector<1x32x32xf32> to vector<32x32xf32>
    %cst_12 = arith.constant dense<0.000000e+00> : vector<32x32xf32>
    %15 = tpu.matmul %12, %14, %cst_12 {dimension_numbers = #tpu.dot_dimension_numbers<[1], [0], [0], [1], [0, 0, 1, 1], [], []>} : vector<32x32xf32>, vector<32x32xf32>, vector<32x32xf32> -> vector<32x32xf32>
    %cst_13 = arith.constant dense<0.000000e+00> : vector<32x32xf32>
    %16 = tpu.matmul %0, %15, %cst_13 {dimension_numbers = #tpu.dot_dimension_numbers<[1], [0], [0], [1], [0, 0, 1, 1], [], []>} : vector<32x32xf32>, vector<32x32xf32>, vector<32x32xf32> -> vector<32x32xf32>
    %c1 = arith.constant 1 : index
    %c0_14 = arith.constant 0 : index
    %c0_15 = arith.constant 0 : index
    %17 = vector.load %arg5[%c1, %c0_14, %c0_15] : memref<3x1x32xf32, #tpu.memory_space<vmem>>, vector<1x1x32xf32>
    %18 = vector.shape_cast %17 : vector<1x1x32xf32> to vector<1x32xf32>
    %19 = vector.broadcast %18 : vector<1x32xf32> to vector<32x32xf32>
    %20 = arith.addf %16, %19 : vector<32x32xf32>
    %cst_16 = arith.constant 0.000000e+00 : f32
    %21 = vector.broadcast %cst_16 : f32 to vector<32x32xf32>
    %22 = arith.maximumf %20, %21 : vector<32x32xf32>
    %c1_17 = arith.constant 1 : index
    %c0_18 = arith.constant 0 : index
    %c0_19 = arith.constant 0 : index
    %23 = vector.load %arg4[%c1_17, %c0_18, %c0_19] : memref<2x32x32xf32, #tpu.memory_space<vmem>>, vector<1x32x32xf32>
    %24 = vector.shape_cast %23 : vector<1x32x32xf32> to vector<32x32xf32>
    %cst_20 = arith.constant dense<0.000000e+00> : vector<32x32xf32>
    %25 = tpu.matmul %22, %24, %cst_20 {dimension_numbers = #tpu.dot_dimension_numbers<[1], [0], [0], [1], [0, 0, 1, 1], [], []>} : vector<32x32xf32>, vector<32x32xf32>, vector<32x32xf32> -> vector<32x32xf32>
    %cst_21 = arith.constant dense<0.000000e+00> : vector<32x32xf32>
    %26 = tpu.matmul %0, %25, %cst_21 {dimension_numbers = #tpu.dot_dimension_numbers<[1], [0], [0], [1], [0, 0, 1, 1], [], []>} : vector<32x32xf32>, vector<32x32xf32>, vector<32x32xf32> -> vector<32x32xf32>
    %c2 = arith.constant 2 : index
    %c0_22 = arith.constant 0 : index
    %c0_23 = arith.constant 0 : index
    %27 = vector.load %arg5[%c2, %c0_22, %c0_23] : memref<3x1x32xf32, #tpu.memory_space<vmem>>, vector<1x1x32xf32>
    %28 = vector.shape_cast %27 : vector<1x1x32xf32> to vector<1x32xf32>
    %29 = vector.broadcast %28 : vector<1x32xf32> to vector<32x32xf32>
    %30 = arith.addf %26, %29 : vector<32x32xf32>
    %cst_24 = arith.constant 0.000000e+00 : f32
    %31 = vector.broadcast %cst_24 : f32 to vector<32x32xf32>
    %32 = arith.maximumf %30, %31 : vector<32x32xf32>
    %33 = vector.shape_cast %32 : vector<32x32xf32> to vector<2x16x32xf32>
    %cst_25 = arith.constant dense<0.000000e+00> : vector<2x32xf32>
    %34 = vector.multi_reduction <add>, %33, %cst_25 [1] : vector<2x16x32xf32> to vector<2x32xf32>
    %cst_26 = arith.constant 1.600000e+01 : f32
    %35 = vector.broadcast %cst_26 : f32 to vector<2x32xf32>
    %36 = arith.divf %34, %35 : vector<2x32xf32>
    %c0_27 = arith.constant 0 : index
    %c0_28 = arith.constant 0 : index
    %37 = vector.load %arg6[%c0_27, %c0_28] : memref<32x32xf32, #tpu.memory_space<vmem>>, vector<32x32xf32>
    %cst_29 = arith.constant dense<0.000000e+00> : vector<2x32xf32>
    %38 = tpu.matmul %36, %37, %cst_29 {dimension_numbers = #tpu.dot_dimension_numbers<[1], [0], [0], [1], [0, 0, 1, 1], [], []>} : vector<2x32xf32>, vector<32x32xf32>, vector<2x32xf32> -> vector<2x32xf32>
    %39 = math.tanh %38 : vector<2x32xf32>
    %40 = vector.shape_cast %39 : vector<2x32xf32> to vector<2x1x32xf32>
    %41 = vector.broadcast %40 : vector<2x1x32xf32> to vector<2x16x32xf32>
    %42 = arith.mulf %33, %41 : vector<2x16x32xf32>
    %cst_30 = arith.constant dense<0.000000e+00> : vector<2x16xf32>
    %43 = vector.multi_reduction <add>, %42, %cst_30 [2] : vector<2x16x32xf32> to vector<2x16xf32>
    %44 = vector.shape_cast %43 : vector<2x16xf32> to vector<2x16x1xf32>
    %cst_31 = arith.constant 1.000000e+01 : f32
    %45 = vector.broadcast %cst_31 : f32 to vector<2x16x1xf32>
    %46 = arith.mulf %44, %45 : vector<2x16x1xf32>
    %47 = arith.negf %46 : vector<2x16x1xf32>
    %48 = math.exp %47 : vector<2x16x1xf32>
    %cst_32 = arith.constant 1.000000e+00 : f32
    %49 = vector.broadcast %cst_32 : f32 to vector<2x16x1xf32>
    %50 = arith.addf %49, %48 : vector<2x16x1xf32>
    %51 = arith.divf %49, %50 : vector<2x16x1xf32>
    %52 = vector.broadcast %51 : vector<2x16x1xf32> to vector<2x16x32xf32>
    %53 = arith.mulf %52, %33 : vector<2x16x32xf32>
    %cst_33 = arith.constant dense<0.000000e+00> : vector<2x32xf32>
    %54 = vector.multi_reduction <add>, %53, %cst_33 [1] : vector<2x16x32xf32> to vector<2x32xf32>
    %c0_34 = arith.constant 0 : index
    %c0_35 = arith.constant 0 : index
    %c0_36 = arith.constant 0 : index
    %55 = vector.load %arg15[%c0_34, %c0_35, %c0_36] : memref<2x16x32xf32, #tpu.memory_space<vmem>>, vector<2x16x32xf32>
    tpu.vector_store %arg15[%c0_34, %c0_35, %c0_36], %33 {strides = array<i32>} : memref<2x16x32xf32, #tpu.memory_space<vmem>>, vector<2x16x32xf32>,
    %c0_37 = arith.constant 0 : index
    %c0_38 = arith.constant 0 : index
    %56 = vector.load %arg16[%c0_37, %c0_38] : memref<2x32xf32, #tpu.memory_space<vmem>>, vector<2x32xf32>
    tpu.vector_store %arg16[%c0_37, %c0_38], %54 {strides = array<i32>} : memref<2x32xf32, #tpu.memory_space<vmem>>, vector<2x32xf32>,
    %c0_39 = arith.constant 0 : index
    %57 = memref.load %arg14[%c0_39] : memref<6xf32, #tpu.memory_space<smem>>
    %c1_40 = arith.constant 1 : index
    %58 = memref.load %arg14[%c1_40] : memref<6xf32, #tpu.memory_space<smem>>
    %c2_41 = arith.constant 2 : index
    %59 = memref.load %arg14[%c2_41] : memref<6xf32, #tpu.memory_space<smem>>
    %c3 = arith.constant 3 : index
    %60 = memref.load %arg14[%c3] : memref<6xf32, #tpu.memory_space<smem>>
    %c4 = arith.constant 4 : index
    %61 = memref.load %arg14[%c4] : memref<6xf32, #tpu.memory_space<smem>>
    %c5 = arith.constant 5 : index
    %62 = memref.load %arg14[%c5] : memref<6xf32, #tpu.memory_space<smem>>
    %c0_42 = arith.constant 0 : index
    %c0_43 = arith.constant 0 : index
    %63 = vector.load %arg11[%c0_42, %c0_43] : memref<1x64xf32, #tpu.memory_space<vmem>>, vector<1x32xf32>
    %c0_44 = arith.constant 0 : index
    %c32 = arith.constant 32 : index
    %64 = vector.load %arg11[%c0_44, %c32] : memref<1x64xf32, #tpu.memory_space<vmem>>, vector<1x32xf32>
    %c0_45 = arith.constant 0 : index
    %c0_46 = arith.constant 0 : index
    %65 = vector.load %arg13[%c0_45, %c0_46] : memref<1x64xf32, #tpu.memory_space<vmem>>, vector<1x32xf32>
    %c0_47 = arith.constant 0 : index
    %c32_48 = arith.constant 32 : index
    %66 = vector.load %arg13[%c0_47, %c32_48] : memref<1x64xf32, #tpu.memory_space<vmem>>, vector<1x32xf32>
    %67 = vector.shape_cast %63 : vector<1x32xf32> to vector<1x1x32xf32>
    %68 = vector.broadcast %67 : vector<1x1x32xf32> to vector<2x16x32xf32>
    %69 = arith.mulf %33, %68 : vector<2x16x32xf32>
    %cst_49 = arith.constant dense<0.000000e+00> : vector<2x16xf32>
    %70 = vector.multi_reduction <add>, %69, %cst_49 [2] : vector<2x16x32xf32> to vector<2x16xf32>
    %71 = vector.broadcast %64 : vector<1x32xf32> to vector<2x32xf32>
    %72 = arith.mulf %54, %71 : vector<2x32xf32>
    %cst_50 = arith.constant dense<0.000000e+00> : vector<2xf32>
    %73 = vector.multi_reduction <add>, %72, %cst_50 [1] : vector<2x32xf32> to vector<2xf32>
    %74 = vector.shape_cast %73 : vector<2xf32> to vector<2x1xf32>
    %75 = vector.broadcast %74 : vector<2x1xf32> to vector<2x16xf32>
    %76 = arith.addf %70, %75 : vector<2x16xf32>
    %77 = vector.broadcast %57 : f32 to vector<2x16xf32>
    %78 = arith.addf %76, %77 : vector<2x16xf32>
    %cst_51 = arith.constant 0.000000e+00 : f32
    %79 = vector.broadcast %cst_51 : f32 to vector<2x16xf32>
    %80 = arith.maximumf %78, %79 : vector<2x16xf32>
    %81 = vector.broadcast %58 : f32 to vector<2x16xf32>
    %82 = arith.mulf %80, %81 : vector<2x16xf32>
    %83 = vector.broadcast %59 : f32 to vector<2x16xf32>
    %84 = arith.addf %82, %83 : vector<2x16xf32>
    %cst_52 = arith.constant 0.000000e+00 : f32
    %85 = vector.broadcast %cst_52 : f32 to vector<2x16xf32>
    %86 = arith.maximumf %84, %85 : vector<2x16xf32>
    %87 = arith.addf %86, %78 : vector<2x16xf32>
    %c0_53 = arith.constant 0 : index
    %c0_54 = arith.constant 0 : index
    %88 = vector.load %arg7[%c0_53, %c0_54] : memref<2x16xf32, #tpu.memory_space<vmem>>, vector<2x16xf32>
    %89 = arith.addf %87, %88 : vector<2x16xf32>
    %cst_55 = arith.constant dense<0xFF800000> : vector<2xf32>
    %90 = vector.multi_reduction <maximumf>, %89, %cst_55 [1] : vector<2x16xf32> to vector<2xf32>
    %91 = vector.shape_cast %90 : vector<2xf32> to vector<2x1xf32>
    %92 = vector.broadcast %91 : vector<2x1xf32> to vector<2x16xf32>
    %93 = arith.subf %89, %92 : vector<2x16xf32>
    %94 = math.exp %93 : vector<2x16xf32>
    %cst_56 = arith.constant dense<0.000000e+00> : vector<2xf32>
    %95 = vector.multi_reduction <add>, %94, %cst_56 [1] : vector<2x16xf32> to vector<2xf32>
    %96 = vector.shape_cast %95 : vector<2xf32> to vector<2x1xf32>
    %97 = math.log %96 : vector<2x1xf32>
    %98 = vector.broadcast %97 : vector<2x1xf32> to vector<2x16xf32>
    %99 = arith.subf %93, %98 : vector<2x16xf32>
    %100 = math.exp %99 : vector<2x16xf32>
    %c0_57 = arith.constant 0 : index
    %c0_58 = arith.constant 0 : index
    %101 = vector.load %arg9[%c0_57, %c0_58] : memref<2x16xf32, #tpu.memory_space<vmem>>, vector<2x16xf32>
    %102 = arith.mulf %101, %99 : vector<2x16xf32>
    %cst_59 = arith.constant dense<0.000000e+00> : vector<2xf32>
    %103 = vector.multi_reduction <add>, %102, %cst_59 [1] : vector<2x16xf32> to vector<2xf32>
    %104 = vector.shape_cast %103 : vector<2xf32> to vector<2x1xf32>
    %105 = arith.mulf %100, %99 : vector<2x16xf32>
    %cst_60 = arith.constant dense<0.000000e+00> : vector<2xf32>
    %106 = vector.multi_reduction <add>, %105, %cst_60 [1] : vector<2x16xf32> to vector<2xf32>
    %107 = vector.shape_cast %106 : vector<2xf32> to vector<2x1xf32>
    %cst_61 = arith.constant 0.000000e+00 : f32
    %108 = vector.broadcast %cst_61 : f32 to vector<2x1xf32>
    %109 = arith.subf %108, %107 : vector<2x1xf32>
    %110 = vector.shape_cast %101 : vector<2x16xf32> to vector<2x16x1xf32>
    %111 = vector.broadcast %110 : vector<2x16x1xf32> to vector<2x16x32xf32>
    %112 = arith.mulf %111, %33 : vector<2x16x32xf32>
    %cst_62 = arith.constant dense<0.000000e+00> : vector<2x32xf32>
    %113 = vector.multi_reduction <add>, %112, %cst_62 [1] : vector<2x16x32xf32> to vector<2x32xf32>
    %c0_63 = arith.constant 0 : index
    %c0_64 = arith.constant 0 : index
    %114 = vector.load %arg12[%c0_63, %c0_64] : memref<64x64xf32, #tpu.memory_space<vmem>>, vector<32x64xf32>
    %cst_65 = arith.constant dense<0.000000e+00> : vector<2x64xf32>
    %115 = tpu.matmul %113, %114, %cst_65 {dimension_numbers = #tpu.dot_dimension_numbers<[1], [0], [0], [1], [0, 0, 1, 1], [], []>} : vector<2x32xf32>, vector<32x64xf32>, vector<2x64xf32> -> vector<2x64xf32>
    %c32_66 = arith.constant 32 : index
    %c0_67 = arith.constant 0 : index
    %116 = vector.load %arg12[%c32_66, %c0_67] : memref<64x64xf32, #tpu.memory_space<vmem>>, vector<32x64xf32>
    %cst_68 = arith.constant dense<0.000000e+00> : vector<2x64xf32>
    %117 = tpu.matmul %54, %116, %cst_68 {dimension_numbers = #tpu.dot_dimension_numbers<[1], [0], [0], [1], [0, 0, 1, 1], [], []>} : vector<2x32xf32>, vector<32x64xf32>, vector<2x64xf32> -> vector<2x64xf32>
    %118 = arith.addf %115, %117 : vector<2x64xf32>
    %119 = math.tanh %118 : vector<2x64xf32>
    %120 = vector.extract_strided_slice %119 {offsets = [0, 0], sizes = [2, 32], strides = [1, 1]} : vector<2x64xf32> to vector<2x32xf32>
    %121 = vector.extract_strided_slice %119 {offsets = [0, 32], sizes = [2, 32], strides = [1, 1]} : vector<2x64xf32> to vector<2x32xf32>
    %122 = vector.shape_cast %120 : vector<2x32xf32> to vector<2x1x32xf32>
    %123 = vector.broadcast %122 : vector<2x1x32xf32> to vector<2x16x32xf32>
    %124 = arith.mulf %123, %33 : vector<2x16x32xf32>
    %cst_69 = arith.constant dense<0.000000e+00> : vector<2x16xf32>
    %125 = vector.multi_reduction <add>, %124, %cst_69 [2] : vector<2x16x32xf32> to vector<2x16xf32>
    %126 = arith.mulf %121, %54 : vector<2x32xf32>
    %cst_70 = arith.constant dense<0.000000e+00> : vector<2xf32>
    %127 = vector.multi_reduction <add>, %126, %cst_70 [1] : vector<2x32xf32> to vector<2xf32>
    %128 = vector.shape_cast %127 : vector<2xf32> to vector<2x1xf32>
    %129 = vector.broadcast %128 : vector<2x1xf32> to vector<2x16xf32>
    %130 = arith.addf %125, %129 : vector<2x16xf32>
    %c0_71 = arith.constant 0 : index
    %c0_72 = arith.constant 0 : index
    %131 = vector.load %arg8[%c0_71, %c0_72] : memref<2x16xf32, #tpu.memory_space<vmem>>, vector<2x16xf32>
    %132 = arith.addf %130, %131 : vector<2x16xf32>
    %cst_73 = arith.constant dense<0xFF800000> : vector<2xf32>
    %133 = vector.multi_reduction <maximumf>, %132, %cst_73 [1] : vector<2x16xf32> to vector<2xf32>
    %134 = vector.shape_cast %133 : vector<2xf32> to vector<2x1xf32>
    %135 = vector.broadcast %134 : vector<2x1xf32> to vector<2x16xf32>
    %136 = arith.subf %132, %135 : vector<2x16xf32>
    %137 = math.exp %136 : vector<2x16xf32>
    %cst_74 = arith.constant dense<0.000000e+00> : vector<2xf32>
    %138 = vector.multi_reduction <add>, %137, %cst_74 [1] : vector<2x16xf32> to vector<2xf32>
    %139 = vector.shape_cast %138 : vector<2xf32> to vector<2x1xf32>
    %140 = math.log %139 : vector<2x1xf32>
    %141 = vector.broadcast %140 : vector<2x1xf32> to vector<2x16xf32>
    %142 = arith.subf %136, %141 : vector<2x16xf32>
    %143 = math.exp %142 : vector<2x16xf32>
    %c0_75 = arith.constant 0 : index
    %c0_76 = arith.constant 0 : index
    %144 = vector.load %arg10[%c0_75, %c0_76] : memref<2x16xf32, #tpu.memory_space<vmem>>, vector<2x16xf32>
    %145 = arith.mulf %144, %142 : vector<2x16xf32>
    %cst_77 = arith.constant dense<0.000000e+00> : vector<2xf32>
    %146 = vector.multi_reduction <add>, %145, %cst_77 [1] : vector<2x16xf32> to vector<2xf32>
    %147 = vector.shape_cast %146 : vector<2xf32> to vector<2x1xf32>
    %148 = arith.mulf %143, %142 : vector<2x16xf32>
    %cst_78 = arith.constant dense<0.000000e+00> : vector<2xf32>
    %149 = vector.multi_reduction <add>, %148, %cst_78 [1] : vector<2x16xf32> to vector<2xf32>
    %150 = vector.shape_cast %149 : vector<2xf32> to vector<2x1xf32>
    %cst_79 = arith.constant 0.000000e+00 : f32
    %151 = vector.broadcast %cst_79 : f32 to vector<2x1xf32>
    %152 = arith.subf %151, %150 : vector<2x1xf32>
    %cst_80 = arith.constant dense<0xFF800000> : vector<2x32xf32>
    %153 = vector.multi_reduction <maximumf>, %33, %cst_80 [1] : vector<2x16x32xf32> to vector<2x32xf32>
    %154 = vector.broadcast %65 : vector<1x32xf32> to vector<2x32xf32>
    %155 = arith.mulf %153, %154 : vector<2x32xf32>
    %cst_81 = arith.constant dense<0.000000e+00> : vector<2xf32>
    %156 = vector.multi_reduction <add>, %155, %cst_81 [1] : vector<2x32xf32> to vector<2xf32>
    %157 = vector.shape_cast %156 : vector<2xf32> to vector<2x1xf32>
    %158 = vector.broadcast %66 : vector<1x32xf32> to vector<2x32xf32>
    %159 = arith.mulf %54, %158 : vector<2x32xf32>
    %cst_82 = arith.constant dense<0.000000e+00> : vector<2xf32>
    %160 = vector.multi_reduction <add>, %159, %cst_82 [1] : vector<2x32xf32> to vector<2xf32>
    %161 = vector.shape_cast %160 : vector<2xf32> to vector<2x1xf32>
    %162 = arith.addf %157, %161 : vector<2x1xf32>
    %163 = vector.broadcast %60 : f32 to vector<2x1xf32>
    %164 = arith.addf %162, %163 : vector<2x1xf32>
    %cst_83 = arith.constant 0.000000e+00 : f32
    %165 = vector.broadcast %cst_83 : f32 to vector<2x1xf32>
    %166 = arith.maximumf %164, %165 : vector<2x1xf32>
    %167 = vector.broadcast %61 : f32 to vector<2x1xf32>
    %168 = arith.mulf %166, %167 : vector<2x1xf32>
    %169 = vector.broadcast %62 : f32 to vector<2x1xf32>
    %170 = arith.addf %168, %169 : vector<2x1xf32>
    %cst_84 = arith.constant 0.000000e+00 : f32
    %171 = vector.broadcast %cst_84 : f32 to vector<2x1xf32>
    %172 = arith.maximumf %170, %171 : vector<2x1xf32>
    %173 = arith.addf %172, %164 : vector<2x1xf32>
    %174 = tpu.iota {dimensions = array<i32: 1>} : vector<2x128xi32>
    %c0_i32 = arith.constant 0 : i32
    %175 = vector.broadcast %c0_i32 : i32 to vector<2x128xi32>
    %176 = arith.cmpi eq, %174, %175 : vector<2x128xi32>
    %cst_85 = arith.constant 0.000000e+00 : f32
    %177 = vector.shape_cast %104 : vector<2x1xf32> to vector<2x1xf32>
    %178 = vector.broadcast %177 : vector<2x1xf32> to vector<2x128xf32>
    %179 = vector.broadcast %cst_85 : f32 to vector<2x128xf32>
    %180 = arith.select %176, %178, %179 : vector<2x128xi1>, vector<2x128xf32>
    %c1_i32 = arith.constant 1 : i32
    %181 = vector.broadcast %c1_i32 : i32 to vector<2x128xi32>
    %182 = arith.cmpi eq, %174, %181 : vector<2x128xi32>
    %cst_86 = arith.constant 0.000000e+00 : f32
    %183 = vector.shape_cast %147 : vector<2x1xf32> to vector<2x1xf32>
    %184 = vector.broadcast %183 : vector<2x1xf32> to vector<2x128xf32>
    %185 = vector.broadcast %cst_86 : f32 to vector<2x128xf32>
    %186 = arith.select %182, %184, %185 : vector<2x128xi1>, vector<2x128xf32>
    %187 = arith.addf %180, %186 : vector<2x128xf32>
    %c2_i32 = arith.constant 2 : i32
    %188 = vector.broadcast %c2_i32 : i32 to vector<2x128xi32>
    %189 = arith.cmpi eq, %174, %188 : vector<2x128xi32>
    %190 = arith.addf %109, %152 : vector<2x1xf32>
    %cst_87 = arith.constant 0.000000e+00 : f32
    %191 = vector.shape_cast %190 : vector<2x1xf32> to vector<2x1xf32>
    %192 = vector.broadcast %191 : vector<2x1xf32> to vector<2x128xf32>
    %193 = vector.broadcast %cst_87 : f32 to vector<2x128xf32>
    %194 = arith.select %189, %192, %193 : vector<2x128xi1>, vector<2x128xf32>
    %195 = arith.addf %187, %194 : vector<2x128xf32>
    %c3_i32 = arith.constant 3 : i32
    %196 = vector.broadcast %c3_i32 : i32 to vector<2x128xi32>
    %197 = arith.cmpi eq, %174, %196 : vector<2x128xi32>
    %cst_88 = arith.constant 0.000000e+00 : f32
    %198 = vector.shape_cast %173 : vector<2x1xf32> to vector<2x1xf32>
    %199 = vector.broadcast %198 : vector<2x1xf32> to vector<2x128xf32>
    %200 = vector.broadcast %cst_88 : f32 to vector<2x128xf32>
    %201 = arith.select %197, %199, %200 : vector<2x128xi1>, vector<2x128xf32>
    %202 = arith.addf %195, %201 : vector<2x128xf32>
    %c0_89 = arith.constant 0 : index
    %c0_90 = arith.constant 0 : index
    %203 = vector.load %arg17[%c0_89, %c0_90] : memref<2x128xf32, #tpu.memory_space<vmem>>, vector<2x128xf32>
    tpu.vector_store %arg17[%c0_89, %c0_90], %202 {strides = array<i32>} : memref<2x128xf32, #tpu.memory_space<vmem>>, vector<2x128xf32>,
    return
  }
  func.func @transform_0(%arg0: i32) -> (i32, i32) {
    %c0_i32 = arith.constant 0 : i32
    %c0_i32_0 = arith.constant 0 : i32
    %c0_i32_1 = arith.constant 0 : i32
    return %c0_i32, %c0_i32_0 : i32, i32
  }
  func.func @transform_1(%arg0: i32) -> (i32, i32) {
    %c0_i32 = arith.constant 0 : i32
    %c0_i32_0 = arith.constant 0 : i32
    %c0_i32_1 = arith.constant 0 : i32
    return %c0_i32, %c0_i32_0 : i32, i32
  }
  func.func @transform_2(%arg0: i32) -> (i32, i32) {
    %c0_i32 = arith.constant 0 : i32
    %c0_i32_0 = arith.constant 0 : i32
    %c0_i32_1 = arith.constant 0 : i32
    return %c0_i32, %c0_i32_0 : i32, i32
  }
  func.func @transform_3(%arg0: i32) -> (i32, i32, i32) {
    %c0_i32 = arith.constant 0 : i32
    %c0_i32_0 = arith.constant 0 : i32
    %c0_i32_1 = arith.constant 0 : i32
    %c0_i32_2 = arith.constant 0 : i32
    return %c0_i32, %c0_i32_0, %c0_i32_1 : i32, i32, i32
  }
  func.func @transform_4(%arg0: i32) -> (i32, i32, i32) {
    %c0_i32 = arith.constant 0 : i32
    %c0_i32_0 = arith.constant 0 : i32
    %c0_i32_1 = arith.constant 0 : i32
    %c0_i32_2 = arith.constant 0 : i32
    return %c0_i32, %c0_i32_0, %c0_i32_1 : i32, i32, i32
  }
  func.func @transform_5(%arg0: i32) -> (i32, i32) {
    %c0_i32 = arith.constant 0 : i32
    %c0_i32_0 = arith.constant 0 : i32
    %c0_i32_1 = arith.constant 0 : i32
    return %c0_i32, %c0_i32_0 : i32, i32
  }
  func.func @transform_6(%arg0: i32) -> (i32, i32) {
    %c0_i32 = arith.constant 0 : i32
    %c0_i32_0 = arith.constant 0 : i32
    %c0_i32_1 = arith.constant 0 : i32
    return %c0_i32, %c0_i32_0 : i32, i32
  }
  func.func @transform_7(%arg0: i32) -> (i32, i32) {
    %c0_i32 = arith.constant 0 : i32
    %c0_i32_0 = arith.constant 0 : i32
    %c0_i32_1 = arith.constant 0 : i32
    return %c0_i32, %c0_i32_0 : i32, i32
  }
  func.func @transform_8(%arg0: i32) -> (i32, i32) {
    %c0_i32 = arith.constant 0 : i32
    %c0_i32_0 = arith.constant 0 : i32
    %c0_i32_1 = arith.constant 0 : i32
    return %c0_i32, %c0_i32_0 : i32, i32
  }
  func.func @transform_9(%arg0: i32) -> (i32, i32) {
    %c0_i32 = arith.constant 0 : i32
    %c0_i32_0 = arith.constant 0 : i32
    %c0_i32_1 = arith.constant 0 : i32
    return %c0_i32, %c0_i32_0 : i32, i32
  }
  func.func @transform_10(%arg0: i32) -> (i32, i32) {
    %c0_i32 = arith.constant 0 : i32
    %c0_i32_0 = arith.constant 0 : i32
    %c0_i32_1 = arith.constant 0 : i32
    return %c0_i32, %c0_i32_0 : i32, i32
  }
  func.func @transform_11(%arg0: i32) -> (i32, i32) {
    %c0_i32 = arith.constant 0 : i32
    %c0_i32_0 = arith.constant 0 : i32
    %c0_i32_1 = arith.constant 0 : i32
    return %c0_i32, %c0_i32_0 : i32, i32
  }
  func.func @transform_12(%arg0: i32) -> (i32, i32) {
    %c0_i32 = arith.constant 0 : i32
    %c0_i32_0 = arith.constant 0 : i32
    %c0_i32_1 = arith.constant 0 : i32
    return %c0_i32, %c0_i32_0 : i32, i32
  }
  func.func @transform_13(%arg0: i32) -> i32 {
    %c0_i32 = arith.constant 0 : i32
    %c0_i32_0 = arith.constant 0 : i32
    return %c0_i32 : i32
  }
  func.func @transform_14(%arg0: i32) -> (i32, i32, i32) {
    %c0_i32 = arith.constant 0 : i32
    %c0_i32_0 = arith.constant 0 : i32
    %c0_i32_1 = arith.constant 0 : i32
    %c0_i32_2 = arith.constant 0 : i32
    return %c0_i32, %c0_i32_0, %c0_i32_1 : i32, i32, i32
  }
  func.func @transform_15(%arg0: i32) -> (i32, i32) {
    %c0_i32 = arith.constant 0 : i32
    %c0_i32_0 = arith.constant 0 : i32
    %c0_i32_1 = arith.constant 0 : i32
    return %c0_i32, %c0_i32_0 : i32, i32
  }
  func.func @transform_16(%arg0: i32) -> (i32, i32) {
    %c0_i32 = arith.constant 0 : i32
    %c0_i32_0 = arith.constant 0 : i32
    %c0_i32_1 = arith.constant 0 : i32
    return %c0_i32, %c0_i32_0 : i32, i32
  }
}

</mosaic_0001>

<bundles_post_ra>
// kernel: actor_critic_forward.1
= control target key start
LH: loop header
LB: loop body
LE: loop exit
PB: predicated region body
PF: predicated region fallthrough
CT: control target
= control target key end

     0   :  { %s2710_s0 = inlined_call_operand.vmem [shape: f32[32,32], index: 0, kind: input, shape index: {}]   ;;  %s2711_s1 = inlined_call_operand.vmem [shape: f32[32,1], index: 1, kind: input, shape index: {}]   ;;  %s2712_s2 = inlined_call_operand.vmem [shape: f32[1,32], index: 2, kind: input, shape index: {}]   ;;  %s2713_s3 = inlined_call_operand.vmem [shape: f32[2,32,32], index: 3, kind: input, shape index: {}]   ;;  %s2714_s4 = inlined_call_operand.vmem [shape: f32[3,1,32], index: 4, kind: input, shape index: {}]   ;;  %s2715_s5 = inlined_call_operand.vmem [shape: f32[32,32], index: 5, kind: input, shape index: {}]   ;;  %s2716_s6 = inlined_call_operand.vmem [shape: f32[2,16], index: 6, kind: input, shape index: {}]   ;;  %s2717_s7 = inlined_call_operand.vmem [shape: f32[2,16], index: 7, kind: input, shape index: {}]   ;;  %s2718_s8 = inlined_call_operand.vmem [shape: f32[2,16], index: 8, kind: input, shape index: {}]   ;;  %s2719_s9 = inlined_call_operand.vmem [shape: f32[2,16], index: 9, kind: input, shape index: {}]   ;;  %s2720_s10 = inlined_call_operand.vmem [shape: f32[1,64], index: 10, kind: input, shape index: {}]   ;;  %s2721_s11 = inlined_call_operand.vmem [shape: f32[64,64], index: 11, kind: input, shape index: {}]   ;;  %s2722_s12 = inlined_call_operand.vmem [shape: f32[1,64], index: 12, kind: input, shape index: {}]   ;;  %s2723_s13 = inlined_call_operand.vmem [shape: f32[6], index: 13, kind: input, shape index: {}]   ;;  %s2724_s14 = inlined_call_operand.vmem [shape: f32[2,16,32], index: 14, kind: output, shape index: {0}]   ;;  %s2725_s15 = inlined_call_operand.vmem [shape: f32[2,32], index: 15, kind: output, shape index: {1}]   ;;  %s2726_s16 = inlined_call_operand.hbm [shape: f32[2,128], index: 16, kind: output, shape index: {2}]  }
   0x1   :  { %2728 = sst [smem:[#allocation8_spill]] %s2710_s0 }
   0x2   :  { %22 = vsyncpa [#allocation4], 0 }
   0x3   :  { %23 = vsyncpa [#allocation3], 0  ;;  %s56_s23 = sshll.u32 %s2723_s13, 4  ;;  %s57_s23 = int_to_ptr.vmem [resolvable:$true] %s56_s23 }
   0x4   :  { %s2093_s24 = scalar_lea.vmem %s57_s23, 16  ;;  %p2098_p1 = scmp.lt.s32.totalorder %s57_s23, %s57_s23 }
   0x5   :  { %p2094_p0 = scmp.ne.s32.totalorder %s57_s23, %s2093_s24  ;;  %p2099_p2 = scmp.lt.s32.totalorder %s2093_s24, %s2093_s24 }
   0x7   :  { %p2100_p3 = por %p2099_p2, %p2098_p1 }
   0x9   :  { %p2101_p4 = pnand %p2100_p3, %p2094_p0 }
   0xb   :  { %2104 = shalt.err (!%p2101_p4)
}
   0xc   :  { %s2131_s25 = smov [#allocation2]  }
   0xd   :  { %59 = dma.vmem_to_smem %s57_s23, 16, %s2131_s25, [#allocation4]  }
   0xe   :  { %2127 = dma.done.wait [#allocation4], 16  }
   0xf   :  { %2128 = vsyncadd [#allocation4], 4294967280 }
  0x10   :  { %63 = sfence }
  0x11   :  { %v70_v0 = vld [vmem:[%s2711_s1 + $0x10] sm:$0xff]  ;;  %v68_v1 = vld [vmem:[%s2711_s1] sm:$0xff]  ;;  %v2132_v2 = vmov 0   ;;  %v71_v3 = vld [vmem:[%s2711_s1 + $0x18] sm:$0xff]  ;;  %s2729_s20 = sld [smem:[#allocation8_spill]]  ;;  %vm110_vm0 = vcmask 261120  }
  0x12   :  { %2036 = vset.pattern.permute.xlu1 %v2132_v2  ;;  %2035 = vset.pattern.permute.xlu0 %v2132_v2  ;;  %v69_v4 = vld [vmem:[%s2711_s1 + $0x8] sm:$0xff]  ;;  %v1764_v8 = vld [vmem:[%s2712_s2] ss:$0 sm:$0xff]  ;;  %v214_v23 = vld [vmem:[%s2713_s3 + $0x10] sm:$0xff]  ;;  %vm2134_vm1 = vmmov 0   ;;  %vm636_vm2 = vcmask 1041409  }
  0x13   :  { %85 = vperm.xlu1 %2036, %v70_v0   ;;  %75 = vperm.xlu0 %2035, %v68_v1   ;;  %v212_v16 = vld [vmem:[%s2713_s3] sm:$0xff]  ;;  %v213_v17 = vld [vmem:[%s2713_s3 + $0x8] sm:$0xff]  ;;  %v215_v24 = vld [vmem:[%s2713_s3 + $0x18] sm:$0xff]  ;;  %vm818_vm3 = vcmask 254976   ;;  %s2138_s24 = smov 32   ;;  %s1800_s27 = sld [smem:[#allocation2 + $0x2]] }
  0x14   :  { %v1974_v19 = vpack.c.bf16 %v213_v17, %v212_v16  ;;  %v1978_v25 = vpack.c.bf16 %v215_v24, %v214_v23  ;;  %v1765_v26 = vld [vmem:[%s2714_s4] ss:$0 sm:$0xff]  ;;  %v1781_v40 = vld [vmem:[%s2713_s3 + $0x28] sm:$0xff]  ;;  %v1782_v48 = vld [vmem:[%s2713_s3 + $0x30] sm:$0xff]  ;;  %vm964_vm4 = vcmask 130112   ;;  %vm977_vm5 = vcmask 123904  }
  0x15   :  { %v1780_v39 = vld [vmem:[%s2713_s3 + $0x20] sm:$0xff]  ;;  %v1783_v49 = vld [vmem:[%s2713_s3 + $0x38] sm:$0xff]  ;;  %s2137_s3 = smov 96   ;;  %s1802_s29 = sld [smem:[#allocation2 + $0x4]] }
  0x16   :  { %v1990_v41 = vpack.c.bf16 %v1781_v40, %v1780_v39  ;;  %v1994_v50 = vpack.c.bf16 %v1783_v49, %v1782_v48  ;;  %v1775_v51 = vld [vmem:[%s2714_s4 + $0x1] ss:$0 sm:$0xff]  ;;  %v2136_v49 = vmov 1966171168   ;;  %s1803_s13 = sld [smem:[#allocation2 + $0x5]]  ;;  %s2139_s30 = smov [#allocation5]  }
  0x17   :  { %90 = vperm.xlu1 %2036, %v71_v3   ;;  %80 = vperm.xlu0 %2035, %v69_v4   ;;  %v2243_v5 = vld [vmem:[%s2729_s20] sm:$0xff]  ;;  %v2261_v20 = vld [vmem:[%s2729_s20 + $0x8] sm:$0xff]  ;;  %v2266_v21 = vld [vmem:[%s2729_s20 + $0x10] sm:$0xff] }
  0x18   :  { %1871 = vmatprep.mubr.msk.f32.mxu1 %vm110_vm0, %v2243_v5  ;;  %1899 = vmatprep.mubr.msk.f32.mxu0 %vm110_vm0, %v2243_v5  ;;  %v2275_v22 = vld [vmem:[%s2729_s20 + $0x18] sm:$0xff] }
  0x92   :  { %v86_v6 = vpop.permute.xlu1 %85  ;;  %v76_v7 = vpop.permute.xlu0 %75 }
  0x93   :  { %v101_v11 = vmul.f32 %v1764_v8, %v86_v6  ;;  %v99_v12 = vmul.f32 %v1764_v8, %v76_v7  ;;  %v630_v6 = vld [vmem:[%s2715_s5] sm:$0xff]  ;;  %v631_v7 = vld [vmem:[%s2715_s5 + $0x8] sm:$0xff] }
  0x96   :  { %v91_v9 = vpop.permute.xlu1 %90  ;;  %v81_v10 = vpop.permute.xlu0 %80 }
  0x97   :  { %v102_v13 = vmul.f32 %v1764_v8, %v91_v9  ;;  %v100_v14 = vmul.f32 %v1764_v8, %v81_v10  ;;  %v632_v8 = vld [vmem:[%s2715_s5 + $0x10] sm:$0xff]  ;;  %v2133_v9 = vmov 0.0|0.0   ;;  %v2007_v10 = vpack.c.bf16 %v631_v7, %v630_v6 }
  0x99   :  { %v1966_v15 = vpack.c.bf16 %v100_v14, %v99_v12  ;;  %v1970_v18 = vpack.c.bf16 %v102_v13, %v101_v11  ;;  %v633_v11 = vld [vmem:[%s2715_s5 + $0x18] sm:$0xff]  ;;  %v2135_v12 = vmov 0.0   ;;  %v1789_v14 = vld [vmem:[%s2714_s4 + $0x2] ss:$0 sm:$0xff] }
  0x9a   :  { %v2010_v13 = vpack.c.bf16 %v633_v11, %v632_v8  ;;  %v2410_v8 = vld [vmem:[%s2718_s8] sm:$0x3] }
  0x9b   :  { %1967 = vmatprep.subr.bf16.mxu1 %v1966_v15 }
  0x9c   :  { %1969 = vmatpush3.bf16.msra.mxu1 %v1966_v15 }
  0x9d   :  { %1971 = vmatprep.subr.bf16.mxu1 %v1970_v18 }
  0xa0   :  { %1973 = vmatpush3.bf16.msra.mxu1 %v1970_v18 }
  0xa1   :  { %1975 = vmatprep.subr.bf16.mxu1 %v1974_v19 }
  0xa3   :  { %1872 = vmatmul.mubr.msk.f32.vlgmr.msra.gmra.mrb[0].mxu1 %vm110_vm0, %v2261_v20 }
  0xa4   :  { %1874 = vmatprep.mubr.msk.f32.mxu1 %vm110_vm0, %v2266_v21  ;;  %1977 = vmatpush3.bf16.msra.mxu1 %v1974_v19 }
  0xa5   :  { %1979 = vmatprep.subr.bf16.mxu1 %v1978_v25 }
  0xa7   :  { %1875 = vmatmul.mubr.msk.f32.gmra.mrb[2].mxu1 %vm110_vm0, %v2275_v22 }
  0xa8   :  { %1981 = vmatpush3.bf16.msra.mxu1 %v1978_v25 }
  0xa9   :  { %1991 = vmatprep.subr.bf16.mxu1 %v1990_v41 }
 0x176   :  { %v1873_v27 = vpop.f32.mrb[0].mxu1 }
 0x177   :  { %v195_v28 = vadd.f32 %v1873_v27, %v1765_v26  ;;  %v189_v29 = vpop.f32.mrb[1].mxu1 }
 0x178   :  { %v190_v30 = vadd.f32 %v1765_v26, %v189_v29 }
 0x179   :  { %v209_v33 = vmax.f32 %v195_v28, 0.0 }
 0x17a   :  { %v208_v31 = vmax.f32 %v190_v30, 0.0  ;;  %v1876_v32 = vpop.f32.mrb[2].mxu1 }
 0x17b   :  { %v205_v34 = vadd.f32 %v1876_v32, %v1765_v26  ;;  %v199_v35 = vpop.f32.mrb[3].mxu1 }
 0x17c   :  { %v200_v36 = vadd.f32 %v1765_v26, %v199_v35  ;;  %1885 = vmatprep.mubr.msk.f32.mxu1 %vm110_vm0, %v208_v31 }
 0x17d   :  { %1886 = vmatmul.mubr.msk.f32.vlgmr.msra.gmra.mrb[4].mxu1 %vm110_vm0, %v209_v33  ;;  %v211_v38 = vmax.f32 %v205_v34, 0.0 }
 0x17e   :  { %v210_v37 = vmax.f32 %v200_v36, 0.0  ;;  %1993 = vmatpush3.bf16.msra.mxu1 %v1990_v41 }
 0x17f   :  { %1995 = vmatprep.subr.bf16.mxu1 %v1994_v50 }
 0x180   :  { %1888 = vmatprep.mubr.msk.f32.mxu1 %vm110_vm0, %v210_v37 }
 0x181   :  { %1889 = vmatmul.mubr.msk.f32.gmra.mrb[6].mxu1 %vm110_vm0, %v211_v38 }
 0x182   :  { %1997 = vmatpush3.bf16.msra.mxu1 %v1994_v50  ;;  %v713_v50 = vunpack.c.l.s4 %v2136_v49 }
 0x183   :  { %2006 = vmatprep.subr.bf16.mxu1 %v2133_v9 }
 0x250   :  { %v1887_v42 = vpop.f32.mrb[4].mxu1 }
 0x251   :  { %v294_v43 = vpop.f32.mrb[5].mxu1 }
 0x252   :  { %v1982_v44 = vpack.c.bf16 %v1887_v42, %v294_v43 }
 0x254   :  { %v1890_v45 = vpop.f32.mrb[6].mxu1  ;;  %1983 = vmatprep.subr.bf16.mxu0 %v1982_v44 }
 0x255   :  { %v304_v46 = vpop.f32.mrb[7].mxu1  ;;  %1985 = vmatpush3.bf16.msra.mxu0 %v1982_v44 }
 0x256   :  { %v1986_v47 = vpack.c.bf16 %v1890_v45, %v304_v46 }
 0x258   :  { %1987 = vmatprep.subr.bf16.mxu0 %v1986_v47 }
 0x259   :  { %1989 = vmatpush3.bf16.msra.mxu0 %v1986_v47 }
 0x25c   :  { %1900 = vmatmul.mubr.msk.f32.vlgmr.msra.gmra.mrb[0].mxu0 %vm110_vm0, %v2261_v20 }
 0x25d   :  { %1902 = vmatprep.mubr.msk.f32.mxu0 %vm110_vm0, %v2266_v21 }
 0x260   :  { %1903 = vmatmul.mubr.msk.f32.gmra.mrb[2].mxu0 %vm110_vm0, %v2275_v22 }
 0x261   :  { %1927 = vmatprep.mubr.msk.f32.mxu0 %vm110_vm0, %v2243_v5 }
 0x32f   :  { %v1901_v52 = vpop.f32.mrb[0].mxu0 }
 0x330   :  { %v393_v53 = vadd.f32 %v1901_v52, %v1775_v51  ;;  %v387_v54 = vpop.f32.mrb[1].mxu0 }
 0x331   :  { %v388_v55 = vadd.f32 %v1775_v51, %v387_v54 }
 0x332   :  { %v407_v58 = vmax.f32 %v393_v53, 0.0  ;;  %v714_v53 = vunpack.c.0.s8 %v713_v50 }
 0x333   :  { %v406_v56 = vmax.f32 %v388_v55, 0.0  ;;  %v1904_v57 = vpop.f32.mrb[2].mxu0 }
 0x334   :  { %v403_v59 = vadd.f32 %v1904_v57, %v1775_v51  ;;  %v397_v60 = vpop.f32.mrb[3].mxu0 }
 0x335   :  { %v398_v61 = vadd.f32 %v1775_v51, %v397_v60  ;;  %1913 = vmatprep.mubr.msk.f32.mxu1 %vm110_vm0, %v406_v56  ;;  %v715_v51 = vlaneseq }
 0x336   :  { %1914 = vmatmul.mubr.msk.f32.vlgmr.msra.gmra.mrb[8].mxu1 %vm110_vm0, %v407_v58  ;;  %v409_v63 = vmax.f32 %v403_v59, 0.0 }
 0x337   :  { %v408_v62 = vmax.f32 %v398_v61, 0.0  ;;  %2008 = vmatpush3.bf16.msra.mxu1 %v2007_v10  ;;  %v2386_v54 = vshrl.u32 %v715_v51, 7 }
 0x338   :  { %2009 = vmatprep.subr.bf16.mxu1 %v2133_v9 }
 0x339   :  { %1916 = vmatprep.mubr.msk.f32.mxu1 %vm110_vm0, %v408_v62  ;;  %v2389_v55 = vsub.s32 %v714_v53, %v2386_v54  ;;  %v2393_v58 = vsub.s32 0, %v2386_v54  ;;  %v2415_v11 = vsub.s32 1, %v2386_v54 }
 0x33a   :  { %1917 = vmatmul.mubr.msk.f32.gmra.mrb[10].mxu1 %vm110_vm0, %v409_v63 }
 0x33b   :  { %1941 = vmatprep.mubr.msk.f32.mxu1 %vm2134_vm1, %v2135_v12  ;;  %2011 = vmatpush3.bf16.msra.mxu1 %v2010_v13  ;;  %v1156_v10 = vrot.slane %v2410_v8, %v2393_v58  ;;  %v1167_v13 = vrot.slane %v2410_v8, %v2415_v11 }
 0x409   :  { %v1915_v0 = vpop.f32.mrb[8].mxu1 }
 0x40a   :  { %v493_v1 = vpop.f32.mrb[9].mxu1 }
 0x40b   :  { %v1998_v2 = vpack.c.bf16 %v1915_v0, %v493_v1 }
 0x40d   :  { %v1918_v3 = vpop.f32.mrb[10].mxu1  ;;  %1999 = vmatprep.subr.bf16.mxu0 %v1998_v2 }
 0x40e   :  { %v503_v4 = vpop.f32.mrb[11].mxu1  ;;  %2001 = vmatpush3.bf16.msra.mxu0 %v1998_v2 }
 0x40f   :  { %v2002_v5 = vpack.c.bf16 %v1918_v3, %v503_v4 }
 0x411   :  { %2003 = vmatprep.subr.bf16.mxu0 %v2002_v5 }
 0x412   :  { %2005 = vmatpush3.bf16.msra.mxu0 %v2002_v5 }
 0x413   :  { %2012 = vmatprep.subr.bf16.mxu0 %v2133_v9 }
 0x415   :  { %1928 = vmatmul.mubr.msk.f32.vlgmr.msra.gmra.mrb[4].mxu0 %vm110_vm0, %v2261_v20 }
 0x416   :  { %1930 = vmatprep.mubr.msk.f32.mxu0 %vm110_vm0, %v2266_v21 }
 0x419   :  { %1931 = vmatmul.mubr.msk.f32.gmra.mrb[6].mxu0 %vm110_vm0, %v2275_v22 }
 0x41a   :  { %1952 = vmatprep.mubr.msk.f32.mxu0 %vm2134_vm1, %v2135_v12 }
 0x4e8   :  { %v1929_v15 = vpop.f32.mrb[4].mxu0 }
 0x4e9   :  { %v592_v16 = vadd.f32 %v1929_v15, %v1789_v14  ;;  %v586_v17 = vpop.f32.mrb[5].mxu0 }
 0x4ea   :  { %v587_v18 = vadd.f32 %v1789_v14, %v586_v17  ;;  %v1202_v17 = vld [vmem:[%s2721_s11 + $0x28] sm:$0xff] }
 0x4eb   :  { %v2347_v19 = vmax.f32 %v592_v16, 0.0  ;;  %v1201_v16 = vld [vmem:[%s2721_s11 + $0x20] sm:$0xff] }
 0x4ec   :  { %v2349_v20 = vmax.f32 %v587_v18, 0.0  ;;  %v1932_v21 = vpop.f32.mrb[6].mxu0 }
 0x4ed   :  { %811 = vst.msk [vmem:[%s2724_s14 + $0x8] sm:$0xff] %vm110_vm0, %v2347_v19  ;;  %v602_v22 = vadd.f32 %v1932_v21, %v1789_v14  ;;  %v596_v23 = vpop.f32.mrb[7].mxu0  ;;  %v610_v24 = vsel %vm110_vm0, %v2347_v19, 0.0 }
 0x4ee   :  { %810 = vst.msk [vmem:[%s2724_s14] sm:$0xff] %vm110_vm0, %v2349_v20  ;;  %v597_v25 = vadd.f32 %v1789_v14, %v596_v23  ;;  %v609_v26 = vsel %vm110_vm0, %v2349_v20, 0.0  ;;  %v2422_v14 = vld [vmem:[%s2720_s10] ss:$0 sm:$0xff]  ;;  %v1203_v23 = vld [vmem:[%s2721_s11 + $0x30] sm:$0xff]  ;;  %s1751_s10 = sshll.u32 %s2139_s30, 4  ;;  %s1752_s10 = int_to_ptr.vmem [resolvable:$true] %s1751_s10 }
 0x4ef   :  { %v2365_v27 = vmax.f32 %v602_v22, 0.0  ;;  %v611_v28 = vadd.f32 %v610_v24, %v609_v26  ;;  %v834_v15 = vmul.f32 %v2422_v14, %v2349_v20  ;;  %v2013_v22 = vpack.c.bf16 %v1202_v17, %v1201_v16  ;;  %v1204_v24 = vld [vmem:[%s2721_s11 + $0x38] sm:$0xff]  ;;  %s2105_s0 = scalar_lea.vmem %s1752_s10, 32  ;;  %p2110_p6 = scmp.lt.s32.totalorder %s1752_s10, %s1752_s10 }
 0x4f0   :  { %v2367_v29 = vmax.f32 %v597_v25, 0.0  ;;  %v2016_v26 = vpack.c.bf16 %v1204_v24, %v1203_v23  ;;  %p2106_p5 = scmp.ne.s32.totalorder %s1752_s10, %s2105_s0  ;;  %p2111_p7 = scmp.lt.s32.totalorder %s2105_s0, %s2105_s0 }
 0x4f1   :  { %813 = vst.msk [vmem:[%s2724_s14 + $0x18] sm:$0xff] %vm110_vm0, %v2365_v27  ;;  %v612_v30 = vrot.slane %v611_v28, 4  ;;  %v619_v31 = vsel %vm110_vm0, %v2365_v27, 0.0  ;;  %v838_v18 = vsel %vm110_vm0, %v834_v15, 0.0  ;;  %2014 = vmatpush3.bf16.msra.mxu0 %v2013_v22 }
 0x4f2   :  { %812 = vst.msk [vmem:[%s2724_s14 + $0x10] sm:$0xff] %vm110_vm0, %v2367_v29  ;;  %v618_v32 = vsel %vm110_vm0, %v2367_v29, 0.0  ;;  %v836_v21 = vmul.f32 %v2422_v14, %v2367_v29  ;;  %2015 = vmatprep.subr.bf16.mxu0 %v2133_v9  ;;  %p2112_p8 = por %p2111_p7, %p2110_p6 }
 0x4f3   :  { %v613_v33 = vadd.f32 %v612_v30, %v611_v28  ;;  %v620_v34 = vadd.f32 %v619_v31, %v618_v32 }
 0x4f4   :  { %v844_v25 = vsel %vm110_vm0, %v836_v21, 0.0  ;;  %p2113_p9 = pnand %p2112_p8, %p2106_p5 }
 0x4f5   :  { %v614_v35 = vrot.slane %v613_v33, 2  ;;  %v621_v36 = vrot.slane %v620_v34, 4  ;;  %2017 = vmatpush3.bf16.msra.mxu0 %v2016_v26 }
 0x4f6   :  { %2018 = vmatprep.subr.bf16.mxu0 %v2133_v9 }
 0x4f7   :  { %v615_v37 = vadd.f32 %v614_v35, %v613_v33  ;;  %v622_v38 = vadd.f32 %v621_v36, %v620_v34 }
 0x4f9   :  { %v616_v39 = vrot.slane %v615_v37, 1  ;;  %v623_v40 = vrot.slane %v622_v38, 2 }
 0x4fb   :  { %v624_v41 = vadd.f32 %v623_v40, %v622_v38  ;;  %v617_v42 = vadd.f32 %v616_v39, %v615_v37 }
 0x4fd   :  { %v625_v43 = vrot.slane %v624_v41, 1  ;;  %v628_v45 = vmul.f32 0.0625, %v617_v42 }
 0x4ff   :  { %v626_v44 = vadd.f32 %v625_v43, %v624_v41 }
 0x501   :  { %v629_v46 = vmul.f32 0.0625, %v626_v44 }
 0x503   :  { %v637_v47 = vsel %vm636_vm2, %v629_v46, %v628_v45 }
 0x504   :  { %1942 = vmatmul.mubr.msk.f32.vlgmr.msra.gmra.mrb[12].mxu1 %vm110_vm0, %v637_v47 }
 0x5d7   :  { %v706_v48 = vpop.f32.mrb[12].mxu1 }
 0x5d8   :  { %2037 = vtanh.f32 %v706_v48  ;;  %v1943_v52 = vpop.f32.mrb[13].mxu1 }
 0x5e2   :  { %v2038_v56 = vpop.eup %2037 }
 0x5e3   :  { %v718_v57 = vrot.slane %v2038_v56, %v2389_v55 }
 0x5e5   :  { %v726_v59 = vrot.slane %v718_v57, %v2389_v55  ;;  %v719_v60 = vcombine.high %v718_v57, %v718_v57 }
 0x5e7   :  { %v737_v61 = vrot.slane %v726_v59, %v2393_v58  ;;  %v733_v62 = vrot.slane %v719_v60, %v2389_v55 }
 0x5e9   :  { %v745_v63 = vmul.f32 %v737_v61, %v2347_v19  ;;  %v744_v0 = vmul.f32 %v737_v61, %v2349_v20  ;;  %v741_v1 = vrot.slane %v733_v62, %v2393_v58 }
 0x5eb   :  { %v751_v2 = vsel %vm110_vm0, %v745_v63, 0.0  ;;  %v748_v3 = vsel %vm110_vm0, %v744_v0, 0.0  ;;  %v746_v4 = vmul.f32 %v741_v1, %v2367_v29  ;;  %v747_v6 = vmul.f32 %v741_v1, %v2365_v27 }
 0x5ec   :  { %752 = vadd.xlane.f32.xlu1 %v751_v2  ;;  %749 = vadd.xlane.f32.xlu0 %v748_v3 }
 0x5ed   :  { %v754_v5 = vsel %vm110_vm0, %v746_v4, 0.0  ;;  %v757_v7 = vsel %vm110_vm0, %v747_v6, 0.0 }
 0x5f0   :  { %755 = vadd.xlane.f32.xlu0 %v754_v5 }
 0x5f4   :  { %758 = vadd.xlane.f32.xlu0 %v757_v7 }
 0x5fd   :  { %1158 = vbcast.lane.b32.xlu1 %v1156_v10, 256 }
 0x601   :  { %1169 = vbcast.lane.b32.xlu1 %v1167_v13, 256 }
 0x605   :  { %1173 = vbcast.lane.b32.xlu1 %v1167_v13, 264 }
 0x609   :  { %850 = vrot.lane.b32.xlu1 %v2422_v14, %s2137_s3 }
 0x60a   :  { %1162 = vbcast.lane.b32.xlu0 %v1156_v10, 264 }
 0x629   :  { %839 = vadd.xlane.f32.xlu0 %v838_v18 }
 0x62d   :  { %845 = vadd.xlane.f32.xlu1 %v844_v25 }
 0x679   :  { %v753_v28 = vpop.xlane.xlu1 %752  ;;  %v750_v30 = vpop.xlane.xlu0 %749 }
 0x67a   :  { %v1796_v31 = vmul.f32 -10.0, %v753_v28  ;;  %v1795_v32 = vmul.f32 -10.0, %v750_v30 }
 0x67c   :  { %v770_v33 = vmul.f32 1.442695, %v1796_v31  ;;  %v768_v34 = vmul.f32 1.442695, %v1795_v32 }
 0x67d   :  { %v756_v35 = vpop.xlane.xlu0 %755  ;;  %v1159_v41 = vpop.permute.xlu1 %1158 }
 0x67e   :  { %2039 = vpow2.f32 %v770_v33  ;;  %v1797_v36 = vmul.f32 -10.0, %v756_v35  ;;  %v1175_v61 = vmul.f32 %v1159_v41, %v2349_v20  ;;  %v1197_v41 = vld [vmem:[%s2721_s11] sm:$0xff] }
 0x67f   :  { %2041 = vpow2.f32 %v768_v34 }
 0x680   :  { %v772_v37 = vmul.f32 1.442695, %v1797_v36  ;;  %v1179_v6 = vsel %vm110_vm0, %v1175_v61, 0.0 }
 0x681   :  { %v759_v38 = vpop.xlane.xlu0 %758  ;;  %v1170_v46 = vpop.permute.xlu1 %1169 }
 0x682   :  { %2043 = vpow2.f32 %v772_v37  ;;  %v1798_v39 = vmul.f32 -10.0, %v759_v38  ;;  %v1177_v62 = vmul.f32 %v1170_v46, %v2367_v29 }
 0x684   :  { %v774_v40 = vmul.f32 1.442695, %v1798_v39  ;;  %v1188_v7 = vsel %vm110_vm0, %v1177_v62, 0.0 }
 0x685   :  { %v1174_v52 = vpop.permute.xlu1 %1173  ;;  %v1163_v53 = vpop.permute.xlu0 %1162 }
 0x686   :  { %2045 = vpow2.f32 %v774_v40  ;;  %v1178_v56 = vmul.f32 %v1174_v52, %v2365_v27  ;;  %v1176_v57 = vmul.f32 %v1163_v53, %v2347_v19  ;;  %v1200_v52 = vld [vmem:[%s2721_s11 + $0x18] sm:$0xff] }
 0x688   :  { %v2040_v42 = vpop.eup %2039  ;;  %v1189_v1 = vsel %vm110_vm0, %v1178_v56, 0.0  ;;  %v1180_v2 = vsel %vm110_vm0, %v1176_v57, 0.0 }
 0x689   :  { %v2042_v43 = vpop.eup %2041  ;;  %v777_v44 = vadd.f32 1.0, %v2040_v42  ;;  %v1190_v13 = vadd.f32 %v1189_v1, %v1188_v7  ;;  %v1181_v15 = vadd.f32 %v1180_v2, %v1179_v6  ;;  %v1198_v42 = vld [vmem:[%s2721_s11 + $0x8] sm:$0xff]  ;;  %v1428_v7 = vld [vmem:[%s2717_s7] sm:$0x3]  ;;  %s1799_s7 = sld [smem:[#allocation2 + $0x1]] }
 0x68a   :  { %v776_v45 = vadd.f32 1.0, %v2042_v43 }
 0x68b   :  { %2047 = vrcp.f32 %v777_v44  ;;  %v1191_v23 = vrot.slane %v1190_v13, 4  ;;  %v1182_v24 = vrot.slane %v1181_v15, 4 }
 0x68c   :  { %v2044_v47 = vpop.eup %2043  ;;  %2049 = vrcp.f32 %v776_v45 }
 0x68d   :  { %v778_v48 = vadd.f32 1.0, %v2044_v47  ;;  %v1192_v31 = vadd.f32 %v1191_v23, %v1190_v13  ;;  %v1183_v32 = vadd.f32 %v1182_v24, %v1181_v15 }
 0x68f   :  { %2051 = vrcp.f32 %v778_v48  ;;  %v1193_v36 = vrot.slane %v1192_v31, 2  ;;  %v1184_v37 = vrot.slane %v1183_v32, 2  ;;  %v2019_v48 = vpack.c.bf16 %v1198_v42, %v1197_v41 }
 0x690   :  { %v2046_v49 = vpop.eup %2045 }
 0x691   :  { %v779_v50 = vadd.f32 1.0, %v2046_v49  ;;  %v1194_v43 = vadd.f32 %v1193_v36, %v1192_v31  ;;  %v1185_v44 = vadd.f32 %v1184_v37, %v1183_v32  ;;  %v851_v49 = vpop.permute.xlu1 %850 }
 0x693   :  { %2053 = vrcp.f32 %v779_v50  ;;  %v1199_v50 = vld [vmem:[%s2721_s11 + $0x10] sm:$0xff]  ;;  %v1195_v53 = vrot.slane %v1194_v43, 1  ;;  %v1186_v56 = vrot.slane %v1185_v44, 1 }
 0x694   :  { %v2022_v62 = vpack.c.bf16 %v1200_v52, %v1199_v50  ;;  %v892_v50 = vstv %s1800_s27 }
 0x695   :  { %v2048_v59 = vpop.eup %2047 }
 0x696   :  { %v2050_v60 = vpop.eup %2049  ;;  %v789_v63 = vmul.f32 %v2048_v59, %v2347_v19 }
 0x697   :  { %v788_v0 = vmul.f32 %v2050_v60, %v2349_v20 }
 0x698   :  { %v793_v3 = vsel %vm110_vm0, %v789_v63, 0.0  ;;  %v1196_v63 = vadd.f32 %v1195_v53, %v1194_v43 }
 0x699   :  { %v2052_v4 = vpop.eup %2051  ;;  %v792_v5 = vsel %vm110_vm0, %v788_v0, 0.0  ;;  %v1187_v0 = vadd.f32 %v1186_v56, %v1185_v44 }
 0x69a   :  { %v794_v10 = vadd.f32 %v793_v3, %v792_v5  ;;  %v790_v16 = vmul.f32 %v2052_v4, %v2367_v29  ;;  %v905_v4 = vld [vmem:[%s2716_s6] sm:$0x3]  ;;  %v835_v5 = vmul.f32 %v2422_v14, %v2347_v19  ;;  %s820_s6 = sld [smem:[#allocation2]] }
 0x69b   :  { %v1279_v3 = vsel %vm636_vm2, %v1196_v63, %v1187_v0 }
 0x69c   :  { %v795_v17 = vrot.slane %v794_v10, 4  ;;  %v801_v25 = vsel %vm110_vm0, %v790_v16, 0.0  ;;  %v841_v6 = vsel %vm110_vm0, %v835_v5, 0.0 }
 0x69d   :  { %v2054_v18 = vpop.eup %2053 }
 0x69e   :  { %v791_v21 = vmul.f32 %v2054_v18, %v2365_v27  ;;  %v796_v22 = vadd.f32 %v795_v17, %v794_v10  ;;  %v1433_v10 = vrot.slane %v1428_v7, %v2393_v58 }
 0x6a0   :  { %v802_v26 = vsel %vm110_vm0, %v791_v21, 0.0  ;;  %v797_v28 = vrot.slane %v796_v22, 2 }
 0x6a1   :  { %v803_v30 = vadd.f32 %v802_v26, %v801_v25 }
 0x6a2   :  { %v798_v34 = vadd.f32 %v797_v28, %v796_v22 }
 0x6a3   :  { %v804_v33 = vrot.slane %v803_v30, 4 }
 0x6a4   :  { %v799_v39 = vrot.slane %v798_v34, 1 }
 0x6a5   :  { %v805_v35 = vadd.f32 %v804_v33, %v803_v30 }
 0x6a6   :  { %v2468_v46 = vadd.f32 %v799_v39, %v798_v34  ;;  %v837_v34 = vmul.f32 %v2422_v14, %v2365_v27  ;;  %v878_v14 = vstv %s820_s6 }
 0x6a7   :  { %v806_v38 = vrot.slane %v805_v35, 2 }
 0x6a8   :  { %v853_v60 = vmul.f32 %v851_v49, %v2468_v46 }
 0x6a9   :  { %v807_v40 = vadd.f32 %v806_v38, %v805_v35  ;;  %v847_v35 = vsel %vm110_vm0, %v837_v34, 0.0 }
 0x6ab   :  { %v808_v45 = vrot.slane %v807_v40, 1 }
 0x6ad   :  { %v2470_v47 = vadd.f32 %v808_v45, %v807_v40 }
 0x6af   :  { %v854_v57 = vmul.f32 %v851_v49, %v2470_v47  ;;  %v816_v59 = vsel %vm636_vm2, %v2470_v47, %v2468_v46 }
 0x6b0   :  { %1402 = vrot.lane.b32.xlu0 %v816_v59, %s2138_s24  ;;  %819 = vst.msk [vmem:[%s2725_s15] sm:$0x3] %vm818_vm3, %v816_v59  ;;  %1953 = vmatmul.mubr.msk.f32.vlgmr.msra.gmra.mrb[8].mxu0 %vm110_vm0, %v816_v59 }
 0x6b1   :  { %v857_v61 = vrot.slane %v854_v57, 7  ;;  %2020 = vmatpush3.bf16.msra.mxu0 %v2019_v48  ;;  %1963 = vmatprep.mubr.msk.f32.mxu0 %vm2134_vm1, %v2135_v12  ;;  %v910_v12 = vrot.slane %v905_v4, %v2393_v58  ;;  %v887_v48 = vstv %s1799_s7  ;;  %v1444_v57 = vrot.slane %v1428_v7, %v2415_v11 }
 0x6b2   :  { %2021 = vmatprep.subr.bf16.mxu0 %v2133_v9  ;;  %v921_v9 = vrot.slane %v905_v4, %v2415_v11 }
 0x6b3   :  { %v858_v1 = vsel %vm636_vm2, %v857_v61, %v853_v60 }
 0x6b4   :  { %v860_v2 = vsel %vm818_vm3, %v858_v1, 0.0 }
 0x6b5   :  { %861 = vadd.xlane.f32.xlu1 %v860_v2  ;;  %2023 = vmatpush3.bf16.msra.mxu0 %v2022_v62 }
 0x6b6   :  { %v840_v16 = vpop.xlane.xlu0 %839 }
 0x6b8   :  { %1964 = vmatmul.mubr.msk.f32.vlgmr.msra.gmra.mrb[8].mxu0 %vm110_vm0, %v1279_v3 }
 0x6c6   :  { %916 = vbcast.lane.b32.xlu1 %v910_v12, 264 }
 0x6ca   :  { %923 = vbcast.lane.b32.xlu1 %v921_v9, 256 }
 0x6ce   :  { %1435 = vbcast.lane.b32.xlu1 %v1433_v10, 256 }
 0x6cf   :  { %842 = vadd.xlane.f32.xlu0 %v841_v6 }
 0x722   :  { %v1403_v18 = vpop.permute.xlu0 %1402 }
 0x75c   :  { %v843_v38 = vpop.xlane.xlu0 %842 }
 0x78b   :  { %v1348_v13 = vpop.f32.mrb[8].mxu0 }
 0x78c   :  { %2055 = vtanh.f32 %v1348_v13  ;;  %v1965_v15 = vpop.f32.mrb[9].mxu0 }
 0x796   :  { %v2056_v17 = vpop.eup %2055 }
 0x797   :  { %v1405_v21 = vmul.f32 %v2056_v17, %v1403_v18  ;;  %v1360_v22 = vrot.slane %v2056_v17, %v2389_v55 }
 0x799   :  { %1407 = vrot.lane.b32.xlu0 %v1405_v21, %s2137_s3  ;;  %v1368_v23 = vrot.slane %v1360_v22, %v2389_v55  ;;  %v1361_v24 = vcombine.high %v1360_v22, %v1360_v22 }
 0x79b   :  { %v1379_v25 = vrot.slane %v1368_v23, %v2393_v58  ;;  %v1375_v26 = vrot.slane %v1361_v24, %v2389_v55  ;;  %v846_v55 = vpop.xlane.xlu1 %845 }
 0x79d   :  { %v1387_v28 = vmul.f32 %v1379_v25, %v2347_v19  ;;  %v1383_v30 = vrot.slane %v1375_v26, %v2393_v58  ;;  %v1386_v37 = vmul.f32 %v1379_v25, %v2349_v20 }
 0x79f   :  { %v1393_v31 = vsel %vm110_vm0, %v1387_v28, 0.0  ;;  %v1389_v32 = vmul.f32 %v1383_v30, %v2365_v27  ;;  %v862_v36 = vpop.xlane.xlu1 %861  ;;  %v1390_v40 = vsel %vm110_vm0, %v1386_v37, 0.0  ;;  %v1388_v41 = vmul.f32 %v1383_v30, %v2367_v29 }
 0x7a0   :  { %1394 = vadd.xlane.f32.xlu1 %v1393_v31  ;;  %v867_v39 = vrot.slane %v862_v36, %v2393_v58  ;;  %v871_v63 = vrot.slane %v862_v36, %v2415_v11 }
 0x7a1   :  { %v1399_v33 = vsel %vm110_vm0, %v1389_v32, 0.0  ;;  %v1396_v43 = vsel %vm110_vm0, %v1388_v41, 0.0 }
 0x7a2   :  { %v875_v42 = vadd.f32 %v867_v39, %v843_v38  ;;  %v874_v0 = vadd.f32 %v867_v39, %v840_v16  ;;  %v876_v1 = vadd.f32 %v871_v63, %v846_v55 }
 0x7a3   :  { %v917_v61 = vpop.permute.xlu1 %916 }
 0x7a4   :  { %1400 = vadd.xlane.f32.xlu1 %v1399_v33  ;;  %v880_v44 = vadd.f32 %v878_v14, %v875_v42  ;;  %v879_v2 = vadd.f32 %v878_v14, %v874_v0  ;;  %v881_v3 = vadd.f32 %v878_v14, %v876_v1 }
 0x7a6   :  { %v884_v45 = vmax.f32 %v880_v44, 0.0  ;;  %v883_v4 = vmax.f32 %v879_v2, 0.0 }
 0x7a7   :  { %v924_v16 = vpop.permute.xlu1 %923 }
 0x7a8   :  { %v889_v49 = vmul.f32 %v887_v48, %v884_v45 }
 0x7aa   :  { %v894_v52 = vadd.f32 %v892_v50, %v889_v49 }
 0x7ac   :  { %v898_v53 = vmax.f32 %v894_v52, 0.0 }
 0x7ae   :  { %v902_v60 = vadd.f32 %v898_v53, %v880_v44 }
 0x7b0   :  { %v2527_v62 = vadd.f32 %v917_v61, %v902_v60 }
 0x7b8   :  { %848 = vadd.xlane.f32.xlu0 %v847_v35  ;;  %v1436_v35 = vpop.permute.xlu1 %1435 }
 0x7ce   :  { %912 = vbcast.lane.b32.xlu0 %v910_v12, 256  ;;  %v885_v12 = vmax.f32 %v881_v3, 0.0 }
 0x7d0   :  { %v890_v5 = vmul.f32 %v887_v48, %v885_v12 }
 0x7d2   :  { %927 = vbcast.lane.b32.xlu0 %v921_v9, 264  ;;  %v888_v9 = vmul.f32 %v887_v48, %v883_v4  ;;  %v895_v7 = vadd.f32 %v892_v50, %v890_v5 }
 0x7d4   :  { %v893_v6 = vadd.f32 %v892_v50, %v888_v9  ;;  %v899_v15 = vmax.f32 %v895_v7, 0.0 }
 0x7d6   :  { %1439 = vbcast.lane.b32.xlu0 %v1433_v10, 264  ;;  %v897_v10 = vmax.f32 %v893_v6, 0.0  ;;  %v903_v23 = vadd.f32 %v899_v15, %v881_v3 }
 0x7d8   :  { %v901_v21 = vadd.f32 %v897_v10, %v879_v2  ;;  %v2534_v28 = vadd.f32 %v924_v16, %v903_v23 }
 0x7f5   :  { %1391 = vadd.xlane.f32.xlu0 %v1390_v40 }
 0x7f9   :  { %1397 = vadd.xlane.f32.xlu0 %v1396_v43 }
 0x80b   :  { %v1408_v56 = vpop.permute.xlu0 %1407 }
 0x80c   :  { %v1410_v59 = vsel %vm818_vm3, %v1408_v56, 0.0 }
 0x80d   :  { %1411 = vadd.xlane.f32.xlu1 %v1410_v59 }
 0x80f   :  { %1450 = vbcast.lane.b32.xlu0 %v1444_v57, 264 }
 0x813   :  { %945 = vperm.xlu0 %2035, %v2527_v62  }
 0x81e   :  { %1446 = vbcast.lane.b32.xlu1 %v1444_v57, 256  ;;  %v2552_v57 = vand.u32 127, %v715_v51 }
 0x820   :  { %v959_v60 = vadd.s32 4294967288, %v2552_v57  ;;  %v2557_v61 = vsub.s32 %v2552_v57, %v2386_v54  ;;  %vm1730_vm6 = vcmp.eq.s32.totalorder %v2552_v57, 1  ;;  %vm1728_vm7 = vcmp.eq.s32.totalorder %v2552_v57, 0 }
 0x821   :  { %vm1733_vm8 = vcmp.eq.s32.totalorder %v2552_v57, 2  ;;  %vm1737_vm9 = vcmp.eq.s32.totalorder %v2552_v57, 3 }
 0x822   :  { %v2560_v0 = vsub.s32 %v959_v60, %v2386_v54 }
 0x82d   :  { %v1395_v55 = vpop.xlane.xlu1 %1394 }
 0x831   :  { %v1401_v37 = vpop.xlane.xlu1 %1400 }
 0x845   :  { %v849_v13 = vpop.xlane.xlu0 %848 }
 0x846   :  { %v877_v17 = vadd.f32 %v871_v63, %v849_v13 }
 0x848   :  { %v882_v18 = vadd.f32 %v878_v14, %v877_v17 }
 0x849   :  { %v913_v22 = vpop.permute.xlu0 %912 }
 0x84a   :  { %v886_v24 = vmax.f32 %v882_v18, 0.0  ;;  %v2531_v25 = vadd.f32 %v913_v22, %v901_v21 }
 0x84c   :  { %v891_v26 = vmul.f32 %v887_v48, %v886_v24  ;;  %942 = vperm.xlu1 %2036, %v2531_v25  }
 0x84d   :  { %v928_v32 = vpop.permute.xlu0 %927 }
 0x84e   :  { %v896_v30 = vadd.f32 %v892_v50, %v891_v26 }
 0x850   :  { %948 = vperm.xlu1 %2036, %v2534_v28   ;;  %v900_v31 = vmax.f32 %v896_v30, 0.0 }
 0x851   :  { %v1440_v36 = vpop.permute.xlu0 %1439 }
 0x852   :  { %v904_v33 = vadd.f32 %v900_v31, %v882_v18 }
 0x854   :  { %v936_v34 = vadd.f32 %v928_v32, %v904_v33 }
 0x856   :  { %951 = vperm.xlu0 %2035, %v936_v34  }
 0x882   :  { %v1392_v38 = vpop.xlane.xlu0 %1391 }
 0x886   :  { %v1398_v43 = vpop.xlane.xlu0 %1397 }
 0x88a   :  { %v1451_v52 = vpop.permute.xlu0 %1450 }
 0x892   :  { %v946_v63 = vpop.permute.xlu0 %945 }
 0x893   :  { %v963_v4 = vrot.slane %v946_v63, %v2560_v0 }
 0x89a   :  { %v1412_v39 = vpop.xlane.xlu1 %1411 }
 0x89b   :  { %v1417_v40 = vrot.slane %v1412_v39, %v2393_v58  ;;  %v1421_v41 = vrot.slane %v1412_v39, %v2415_v11 }
 0x89d   :  { %v1424_v42 = vadd.f32 %v1417_v40, %v1392_v38  ;;  %v1425_v14 = vadd.f32 %v1417_v40, %v1395_v55  ;;  %v1427_v44 = vadd.f32 %v1421_v41, %v1401_v37  ;;  %v1426_v45 = vadd.f32 %v1421_v41, %v1398_v43 }
 0x89e   :  { %v1447_v50 = vpop.permute.xlu1 %1446 }
 0x89f   :  { %v2539_v48 = vadd.f32 %v1440_v36, %v1425_v14  ;;  %v2541_v49 = vadd.f32 %v1436_v35, %v1424_v42  ;;  %v2545_v53 = vadd.f32 %v1447_v50, %v1426_v45  ;;  %v2547_v56 = vadd.f32 %v1451_v52, %v1427_v44 }
 0x8a1   :  { %1468 = vperm.xlu0 %2035, %v2539_v48   ;;  %1465 = vperm.xlu1 %2036, %v2541_v49  }
 0x8a5   :  { %1471 = vperm.xlu1 %2036, %v2545_v53   ;;  %1474 = vperm.xlu0 %2035, %v2547_v56  }
 0x8cb   :  { %v943_v59 = vpop.permute.xlu1 %942 }
 0x8cc   :  { %v958_v2 = vrot.slane %v943_v59, %v2557_v61 }
 0x8ce   :  { %v965_v9 = vsel %vm964_vm4, %v963_v4, %v958_v2 }
 0x8cf   :  { %v949_v1 = vpop.permute.xlu1 %948 }
 0x8d0   :  { %v969_v51 = vrot.slane %v949_v1, %v2557_v61 }
 0x8d5   :  { %v952_v3 = vpop.permute.xlu0 %951 }
 0x8d6   :  { %v973_v12 = vrot.slane %v952_v3, %v2560_v0 }
 0x8d8   :  { %v974_v5 = vsel %vm964_vm4, %v973_v12, %v969_v51 }
 0x8d9   :  { %v975_v6 = vsel %vm636_vm2, %v974_v5, %v965_v9 }
 0x8da   :  { %v978_v54 = vsel %vm977_vm5, %v975_v6, -inf }
 0x8db   :  { %979 = vmax.xlane.f32.xlu1 %v978_v54 }
 0x920   :  { %v1466_v7 = vpop.permute.xlu1 %1465  ;;  %v1469_v10 = vpop.permute.xlu0 %1468 }
 0x921   :  { %v1479_v13 = vrot.slane %v1466_v7, %v2557_v61  ;;  %v1483_v15 = vrot.slane %v1469_v10, %v2560_v0 }
 0x923   :  { %v1484_v23 = vsel %vm964_vm4, %v1483_v15, %v1479_v13 }
 0x924   :  { %v1472_v17 = vpop.permute.xlu1 %1471  ;;  %v1475_v18 = vpop.permute.xlu0 %1474 }
 0x925   :  { %v1488_v21 = vrot.slane %v1472_v17, %v2557_v61  ;;  %v1492_v22 = vrot.slane %v1475_v18, %v2560_v0 }
 0x927   :  { %v1493_v24 = vsel %vm964_vm4, %v1492_v22, %v1488_v21 }
 0x928   :  { %v1494_v16 = vsel %vm636_vm2, %v1493_v24, %v1484_v23 }
 0x929   :  { %v1496_v26 = vsel %vm977_vm5, %v1494_v16, -inf }
 0x92a   :  { %1497 = vmax.xlane.f32.xlu0 %v1496_v26 }
 0x968   :  { %v980_v30 = vpop.xlane.xlu1 %979 }
 0x969   :  { %v985_v31 = vrot.slane %v980_v30, %v2393_v58  ;;  %v989_v32 = vrot.slane %v980_v30, %v2415_v11 }
 0x96b   :  { %v992_v33 = vsub.f32 %v2531_v25, %v985_v31  ;;  %v2582_v35 = vsub.f32 %v2527_v62, %v985_v31  ;;  %v2584_v55 = vsub.f32 %v936_v34, %v989_v32  ;;  %v2587_v36 = vsub.f32 %v2534_v28, %v989_v32 }
 0x96d   :  { %v996_v37 = vmul.f32 1.442695, %v992_v33  ;;  %v998_v38 = vmul.f32 1.442695, %v2582_v35  ;;  %v1002_v39 = vmul.f32 1.442695, %v2584_v55 }
 0x96e   :  { %v1000_v40 = vmul.f32 1.442695, %v2587_v36 }
 0x96f   :  { %2057 = vpow2.f32 %v996_v37 }
 0x970   :  { %2059 = vpow2.f32 %v998_v38 }
 0x971   :  { %2061 = vpow2.f32 %v1002_v39 }
 0x972   :  { %2063 = vpow2.f32 %v1000_v40 }
 0x979   :  { %v2058_v25 = vpop.eup %2057 }
 0x97a   :  { %v2060_v41 = vpop.eup %2059  ;;  %1009 = vperm.xlu0 %2035, %v2058_v25  }
 0x97b   :  { %1012 = vperm.xlu1 %2036, %v2060_v41   ;;  %v2062_v62 = vpop.eup %2061 }
 0x97c   :  { %v2064_v34 = vpop.eup %2063 }
 0x97e   :  { %1018 = vperm.xlu0 %2035, %v2062_v62  }
 0x97f   :  { %1015 = vperm.xlu1 %2036, %v2064_v34  }
 0x9b7   :  { %v1498_v28 = vpop.xlane.xlu0 %1497 }
 0x9b8   :  { %v1503_v3 = vrot.slane %v1498_v28, %v2393_v58  ;;  %v1507_v12 = vrot.slane %v1498_v28, %v2415_v11 }
 0x9ba   :  { %v2602_v51 = vsub.f32 %v2541_v49, %v1503_v3  ;;  %v2606_v9 = vsub.f32 %v2539_v48, %v1503_v3  ;;  %v2610_v54 = vsub.f32 %v2545_v53, %v1507_v12  ;;  %v2615_v49 = vsub.f32 %v2547_v56, %v1507_v12 }
 0x9bc   :  { %v1514_v5 = vmul.f32 1.442695, %v2602_v51  ;;  %v1516_v7 = vmul.f32 1.442695, %v2606_v9  ;;  %v1518_v15 = vmul.f32 1.442695, %v2610_v54 }
 0x9bd   :  { %v1520_v17 = vmul.f32 1.442695, %v2615_v49 }
 0x9f9   :  { %v1010_v42 = vpop.permute.xlu0 %1009 }
 0x9fa   :  { %v1013_v14 = vpop.permute.xlu1 %1012  ;;  %v1023_v44 = vrot.slane %v1010_v42, %v2557_v61 }
 0x9fb   :  { %v1027_v43 = vrot.slane %v1013_v14, %v2560_v0 }
 0x9fd   :  { %v1019_v45 = vpop.permute.xlu0 %1018  ;;  %v1028_v60 = vsel %vm964_vm4, %v1027_v43, %v1023_v44 }
 0x9fe   :  { %v1016_v50 = vpop.permute.xlu1 %1015  ;;  %v1036_v52 = vrot.slane %v1019_v45, %v2560_v0 }
 0x9ff   :  { %v1032_v59 = vrot.slane %v1016_v50, %v2557_v61 }
 0xa01   :  { %v1037_v63 = vsel %vm964_vm4, %v1036_v52, %v1032_v59 }
 0xa02   :  { %v1038_v1 = vsel %vm636_vm2, %v1037_v63, %v1028_v60 }
 0xa03   :  { %v1040_v2 = vsel %vm977_vm5, %v1038_v1, 0.0 }
 0xa04   :  { %1041 = vadd.xlane.f32.xlu1 %v1040_v2 }
 0xa91   :  { %v1042_v4 = vpop.xlane.xlu1 %1041 }
 0xa92   :  { %2065 = vlog2.f32 %v1042_v4 }
 0xa93   :  { %2067 = vpow2.f32 %v1514_v5 }
 0xa94   :  { %2069 = vpow2.f32 %v1516_v7 }
 0xa95   :  { %2071 = vpow2.f32 %v1518_v15 }
 0xa96   :  { %2073 = vpow2.f32 %v1520_v17 }
 0xa9c   :  { %v2066_v6 = vpop.eup %2065 }
 0xa9d   :  { %v1044_v10 = vmul.f32 0.6931472, %v2066_v6  ;;  %v2068_v18 = vpop.eup %2067 }
 0xa9e   :  { %v2070_v53 = vpop.eup %2069 }
 0xa9f   :  { %v1049_v13 = vrot.slane %v1044_v10, %v2393_v58  ;;  %v2072_v21 = vpop.eup %2071  ;;  %v1053_v56 = vrot.slane %v1044_v10, %v2415_v11 }
 0xaa0   :  { %v2074_v22 = vpop.eup %2073 }
 0xaa1   :  { %v1056_v48 = vsub.f32 %v992_v33, %v1049_v13  ;;  %v1057_v23 = vsub.f32 %v2582_v35, %v1049_v13  ;;  %v1058_v24 = vsub.f32 %v2587_v36, %v1053_v56  ;;  %v1059_v16 = vsub.f32 %v2584_v55, %v1053_v56 }
 0xaa3   :  { %1074 = vperm.xlu0 %2035, %v1056_v48   ;;  %v1060_v25 = vmul.f32 1.442695, %v1056_v48  ;;  %v1062_v34 = vmul.f32 1.442695, %v1057_v23  ;;  %v1064_v4 = vmul.f32 1.442695, %v1058_v24 }
 0xaa4   :  { %v1066_v5 = vmul.f32 1.442695, %v1059_v16 }
 0xaa5   :  { %2075 = vpow2.f32 %v1060_v25 }
 0xaa6   :  { %2077 = vpow2.f32 %v1062_v34 }
 0xaa7   :  { %1527 = vperm.xlu0 %2035, %v2068_v18   ;;  %2079 = vpow2.f32 %v1064_v4 }
 0xaa8   :  { %2081 = vpow2.f32 %v1066_v5 }
 0xaab   :  { %1530 = vperm.xlu0 %2035, %v2070_v53  }
 0xaaf   :  { %1533 = vperm.xlu0 %2035, %v2072_v21   ;;  %v2076_v63 = vpop.eup %2075 }
 0xab0   :  { %v1109_v2 = vmul.f32 %v2076_v63, %v1056_v48  ;;  %v2078_v3 = vpop.eup %2077 }
 0xab1   :  { %v1110_v12 = vmul.f32 %v2078_v3, %v1057_v23  ;;  %v2080_v6 = vpop.eup %2079 }
 0xab2   :  { %v1111_v7 = vmul.f32 %v2080_v6, %v1058_v24  ;;  %v2082_v10 = vpop.eup %2081 }
 0xab3   :  { %1536 = vperm.xlu0 %2035, %v2074_v22   ;;  %v1112_v13 = vmul.f32 %v2082_v10, %v1059_v16 }
 0xab7   :  { %1077 = vperm.xlu0 %2035, %v1057_v23  }
 0xabb   :  { %1080 = vperm.xlu0 %2035, %v1058_v24  }
 0xabf   :  { %1083 = vperm.xlu0 %2035, %v1059_v16  }
 0xb22   :  { %v1075_v26 = vpop.permute.xlu0 %1074 }
 0xb23   :  { %v1088_v43 = vrot.slane %v1075_v26, %v2557_v61 }
 0xb26   :  { %v1528_v30 = vpop.permute.xlu0 %1527 }
 0xb27   :  { %v1541_v38 = vrot.slane %v1528_v30, %v2557_v61 }
 0xb2a   :  { %v1531_v31 = vpop.permute.xlu0 %1530 }
 0xb2b   :  { %v1545_v33 = vrot.slane %v1531_v31, %v2560_v0 }
 0xb2d   :  { %v1546_v40 = vsel %vm964_vm4, %v1545_v33, %v1541_v38 }
 0xb2e   :  { %v1534_v32 = vpop.permute.xlu0 %1533 }
 0xb2f   :  { %v1550_v39 = vrot.slane %v1534_v32, %v2557_v61 }
 0xb32   :  { %v1537_v37 = vpop.permute.xlu0 %1536 }
 0xb33   :  { %v1554_v35 = vrot.slane %v1537_v37, %v2560_v0 }
 0xb35   :  { %v1555_v36 = vsel %vm964_vm4, %v1554_v35, %v1550_v39 }
 0xb36   :  { %v1078_v55 = vpop.permute.xlu0 %1077  ;;  %v1556_v41 = vsel %vm636_vm2, %v1555_v36, %v1546_v40 }
 0xb37   :  { %v1558_v62 = vsel %vm977_vm5, %v1556_v41, 0.0  ;;  %v1092_v42 = vrot.slane %v1078_v55, %v2560_v0  ;;  %v1680_v55 = vsel %vm110_vm0, %v2367_v29, -inf  ;;  %v1681_v41 = vsel %vm110_vm0, %v2365_v27, -inf }
 0xb38   :  { %1559 = vadd.xlane.f32.xlu1 %v1558_v62 }
 0xb39   :  { %v1093_v50 = vsel %vm964_vm4, %v1092_v42, %v1088_v43  ;;  %v1671_v42 = vsel %vm110_vm0, %v2349_v20, -inf }
 0xb3a   :  { %v1081_v28 = vpop.permute.xlu0 %1080 }
 0xb3b   :  { %v1097_v44 = vrot.slane %v1081_v28, %v2557_v61  ;;  %v1682_v28 = vmax.f32 %v1680_v55, %v1681_v41 }
 0xb3e   :  { %v1084_v14 = vpop.permute.xlu0 %1083 }
 0xb3f   :  { %v1101_v45 = vrot.slane %v1084_v14, %v2560_v0  ;;  %v1672_v14 = vsel %vm110_vm0, %v2347_v19, -inf }
 0xb41   :  { %v1102_v52 = vsel %vm964_vm4, %v1101_v45, %v1097_v44  ;;  %v1683_v45 = vrot.slane %v1682_v28, 4 }
 0xb42   :  { %v1103_v59 = vsel %vm636_vm2, %v1102_v52, %v1093_v50  ;;  %v1673_v50 = vmax.f32 %v1671_v42, %v1672_v14 }
 0xb43   :  { %v1105_v60 = vmul.f32 %v1103_v59, %v2410_v8  ;;  %v1684_v52 = vmax.f32 %v1682_v28, %v1683_v45 }
 0xb44   :  { %v1674_v27 = vrot.slane %v1673_v50, 4 }
 0xb45   :  { %v1106_v1 = vsel %vm977_vm5, %v1105_v60, 0.0  ;;  %v1685_v59 = vrot.slane %v1684_v52, 2 }
 0xb46   :  { %1107 = vadd.xlane.f32.xlu0 %v1106_v1  ;;  %v1675_v60 = vmax.f32 %v1673_v50, %v1674_v27 }
 0xb47   :  { %v1686_v63 = vmax.f32 %v1684_v52, %v1685_v59  ;;  %v1722_v59 = vstv %s1802_s29 }
 0xb48   :  { %v1676_v1 = vrot.slane %v1675_v60, 2 }
 0xb49   :  { %1118 = vperm.xlu1 %2036, %v1109_v2   ;;  %v1687_v2 = vrot.slane %v1686_v63, 1 }
 0xb4a   :  { %v1677_v3 = vmax.f32 %v1675_v60, %v1676_v1 }
 0xb4b   :  { %v1688_v4 = vmax.f32 %v1686_v63, %v1687_v2  ;;  %v1724_v63 = vstv %s1803_s13 }
 0xb4c   :  { %v1678_v20 = vrot.slane %v1677_v3, 1 }
 0xb4d   :  { %1121 = vperm.xlu1 %2036, %v1110_v12  }
 0xb4e   :  { %v1679_v5 = vmax.f32 %v1677_v3, %v1678_v20 }
 0xb5c   :  { %1124 = vperm.xlu0 %2035, %v1111_v7  }
 0xb60   :  { %1127 = vperm.xlu0 %2035, %v1112_v13  }
 0xbc5   :  { %v1560_v8 = vpop.xlane.xlu1 %1559 }
 0xbc6   :  { %2083 = vlog2.f32 %v1560_v8 }
 0xbc9   :  { %v1119_v18 = vpop.permute.xlu1 %1118 }
 0xbcd   :  { %v1122_v23 = vpop.permute.xlu1 %1121 }
 0xbce   :  { %v1136_v26 = vrot.slane %v1122_v23, %v2560_v0 }
 0xbd0   :  { %v2084_v15 = vpop.eup %2083 }
 0xbd1   :  { %v1562_v17 = vmul.f32 0.6931472, %v2084_v15 }
 0xbd3   :  { %v1567_v48 = vrot.slane %v1562_v17, %v2393_v58  ;;  %v2642_v21 = vpop.xlane.xlu0 %1107  ;;  %v1571_v22 = vrot.slane %v1562_v17, %v2415_v11  ;;  %v1132_v58 = vrot.slane %v1119_v18, %v2557_v61 }
 0xbd4   :  { %v1729_v28 = vsel %vm1728_vm7, %v2642_v21, 0.0 }
 0xbd5   :  { %v1574_v53 = vsub.f32 %v2602_v51, %v1567_v48  ;;  %v1575_v56 = vsub.f32 %v2606_v9, %v1567_v48  ;;  %v1576_v16 = vsub.f32 %v2610_v54, %v1571_v22  ;;  %v1577_v32 = vsub.f32 %v2615_v49, %v1571_v22  ;;  %v1807_v49 = vld [vmem:[%s2722_s12] ss:$0 sm:$0xff] }
 0xbd6   :  { %v1137_v11 = vsel %vm964_vm4, %v1136_v26, %v1132_v58  ;;  %v1696_v12 = vmul.f32 %v1807_v49, %v1688_v4  ;;  %v1695_v6 = vmul.f32 %v1807_v49, %v1679_v5 }
 0xbd7   :  { %1592 = vperm.xlu1 %2036, %v1574_v53   ;;  %v1578_v37 = vmul.f32 1.442695, %v1574_v53  ;;  %v1580_v38 = vmul.f32 1.442695, %v1575_v56  ;;  %v1582_v39 = vmul.f32 1.442695, %v1576_v16 }
 0xbd8   :  { %v1584_v35 = vmul.f32 1.442695, %v1577_v32  ;;  %v1699_v19 = vrot.slane %v1696_v12, 7 }
 0xbd9   :  { %2085 = vpow2.f32 %v1578_v37 }
 0xbda   :  { %2087 = vpow2.f32 %v1580_v38  ;;  %v1700_v7 = vsel %vm636_vm2, %v1699_v19, %v1695_v6 }
 0xbdb   :  { %v1125_v24 = vpop.permute.xlu0 %1124  ;;  %1595 = vperm.xlu1 %2036, %v1575_v56   ;;  %2089 = vpow2.f32 %v1582_v39  ;;  %v1702_v10 = vsel %vm818_vm3, %v1700_v7, 0.0 }
 0xbdc   :  { %v1141_v51 = vrot.slane %v1125_v24, %v2557_v61  ;;  %2091 = vpow2.f32 %v1584_v35 }
 0xbdf   :  { %v1128_v30 = vpop.permute.xlu0 %1127  ;;  %1598 = vperm.xlu1 %2036, %v1576_v16  }
 0xbe0   :  { %v1145_v31 = vrot.slane %v1128_v30, %v2560_v0 }
 0xbe2   :  { %v1146_v9 = vsel %vm964_vm4, %v1145_v31, %v1141_v51 }
 0xbe3   :  { %1601 = vperm.xlu1 %2036, %v1577_v32   ;;  %v1147_v33 = vsel %vm636_vm2, %v1146_v9, %v1137_v11  ;;  %v2086_v40 = vpop.eup %2085 }
 0xbe4   :  { %v1149_v54 = vsel %vm977_vm5, %v1147_v33, 0.0  ;;  %v1627_v36 = vmul.f32 %v2086_v40, %v1574_v53  ;;  %v2088_v25 = vpop.eup %2087 }
 0xbe5   :  { %1150 = vadd.xlane.f32.xlu0 %v1149_v54  ;;  %v1628_v62 = vmul.f32 %v2088_v25, %v1575_v56  ;;  %v2090_v34 = vpop.eup %2089  ;;  %v1586_v56 = vld [vmem:[%s2719_s9] sm:$0x3]  ;;  %s1801_s9 = sld [smem:[#allocation2 + $0x3]] }
 0xbe6   :  { %v1629_v43 = vmul.f32 %v2090_v34, %v1576_v16  ;;  %v2092_v44 = vpop.eup %2091 }
 0xbe7   :  { %v1630_v29 = vmul.f32 %v2092_v44, %v1577_v32 }
 0xbeb   :  { %v1719_v44 = vstv %s1801_s9 }
 0xbfb   :  { %1705 = vrot.lane.b32.xlu0 %v1807_v49, %s2137_s3 }
 0xbff   :  { %1636 = vperm.xlu0 %2035, %v1627_v36  }
 0xc03   :  { %1639 = vperm.xlu0 %2035, %v1628_v62  }
 0xc07   :  { %1642 = vperm.xlu0 %2035, %v1629_v43  }
 0xc0b   :  { %1645 = vperm.xlu0 %2035, %v1630_v29  }
 0xc2a   :  { %1703 = vadd.xlane.f32.xlu0 %v1702_v10 }
 0xc56   :  { %v1593_v13 = vpop.permute.xlu1 %1592 }
 0xc57   :  { %v1606_v18 = vrot.slane %v1593_v13, %v2557_v61 }
 0xc5a   :  { %v1596_v8 = vpop.permute.xlu1 %1595 }
 0xc5b   :  { %v1610_v17 = vrot.slane %v1596_v8, %v2560_v0 }
 0xc5d   :  { %v1611_v23 = vsel %vm964_vm4, %v1610_v17, %v1606_v18 }
 0xc5e   :  { %v1599_v15 = vpop.permute.xlu1 %1598 }
 0xc5f   :  { %v1615_v53 = vrot.slane %v1599_v15, %v2557_v61 }
 0xc62   :  { %v1602_v48 = vpop.permute.xlu1 %1601 }
 0xc63   :  { %v1619_v22 = vrot.slane %v1602_v48, %v2560_v0 }
 0xc65   :  { %v1620_v24 = vsel %vm964_vm4, %v1619_v22, %v1615_v53 }
 0xc66   :  { %v1621_v16 = vsel %vm636_vm2, %v1620_v24, %v1611_v23 }
 0xc67   :  { %v1623_v26 = vmul.f32 %v1621_v16, %v1586_v56 }
 0xc69   :  { %v1624_v30 = vsel %vm977_vm5, %v1623_v26, 0.0 }
 0xc6a   :  { %1625 = vadd.xlane.f32.xlu1 %v1624_v30 }
 0xc72   :  { %v1151_v58 = vpop.xlane.xlu0 %1150 }
 0xc73   :  { %v1152_v62 = vsub.f32 0.0, %v1151_v58 }
 0xc76   :  { %v1706_v51 = vpop.permute.xlu0 %1705 }
 0xc77   :  { %v1709_v9 = vmul.f32 %v1706_v51, %v2470_v47  ;;  %v1708_v36 = vmul.f32 %v1706_v51, %v2468_v46 }
 0xc79   :  { %v1712_v35 = vrot.slane %v1709_v9, 7 }
 0xc7b   :  { %v1713_v55 = vsel %vm636_vm2, %v1712_v35, %v1708_v36 }
 0xc7c   :  { %v1715_v41 = vsel %vm818_vm3, %v1713_v55, 0.0 }
 0xc7e   :  { %v1637_v31 = vpop.permute.xlu0 %1636 }
 0xc7f   :  { %v1650_v37 = vrot.slane %v1637_v31, %v2557_v61 }
 0xc82   :  { %v1640_v32 = vpop.permute.xlu0 %1639 }
 0xc83   :  { %v1654_v33 = vrot.slane %v1640_v32, %v2560_v0 }
 0xc85   :  { %v1655_v40 = vsel %vm964_vm4, %v1654_v33, %v1650_v37 }
 0xc86   :  { %v1643_v11 = vpop.permute.xlu0 %1642 }
 0xc87   :  { %v1659_v38 = vrot.slane %v1643_v11, %v2557_v61 }
 0xc8a   :  { %v1646_v54 = vpop.permute.xlu0 %1645 }
 0xc8b   :  { %v1663_v39 = vrot.slane %v1646_v54, %v2560_v0 }
 0xc8d   :  { %v1664_v49 = vsel %vm964_vm4, %v1663_v39, %v1659_v38 }
 0xc8e   :  { %v1665_v25 = vsel %vm636_vm2, %v1664_v49, %v1655_v40 }
 0xc8f   :  { %v1667_v47 = vsel %vm977_vm5, %v1665_v25, 0.0 }
 0xc90   :  { %1668 = vadd.xlane.f32.xlu1 %v1667_v47 }
 0xc94   :  { %1716 = vadd.xlane.f32.xlu1 %v1715_v41 }
 0xcb7   :  { %v1704_v14 = vpop.xlane.xlu0 %1703 }
 0xcf7   :  { %v1626_v61 = vpop.xlane.xlu1 %1625 }
 0xcf8   :  { %v1731_v46 = vsel %vm1730_vm6, %v1626_v61, 0.0 }
 0xcf9   :  { %v1732_v43 = vadd.f32 %v1731_v46, %v1729_v28 }
 0xd1d   :  { %v1669_v0 = vpop.xlane.xlu1 %1668 }
 0xd1e   :  { %v1670_v34 = vsub.f32 0.0, %v1669_v0 }
 0xd20   :  { %v1734_v42 = vadd.f32 %v1670_v34, %v1152_v62 }
 0xd21   :  { %v1717_v45 = vpop.xlane.xlu1 %1716 }
 0xd22   :  { %v1718_v50 = vadd.f32 %v1717_v45, %v1704_v14  ;;  %v1735_v29 = vsel %vm1733_vm8, %v1734_v42, 0.0 }
 0xd23   :  { %v1736_v52 = vadd.f32 %v1735_v29, %v1732_v43 }
 0xd24   :  { %v1720_v27 = vadd.f32 %v1719_v44, %v1718_v50 }
 0xd26   :  { %v1721_v60 = vmax.f32 %v1720_v27, 0.0 }
 0xd28   :  { %v1723_v1 = vmul.f32 %v1722_v59, %v1721_v60 }
 0xd2a   :  { %v1725_v2 = vadd.f32 %v1724_v63, %v1723_v1 }
 0xd2c   :  { %v1726_v3 = vmax.f32 %v1725_v2, 0.0 }
 0xd2e   :  { %v1727_v4 = vadd.f32 %v1726_v3, %v1720_v27 }
 0xd30   :  { %v1738_v21 = vsel %vm1737_vm9, %v1727_v4, 0.0 }
 0xd31   :  { %v1739_v20 = vadd.f32 %v1738_v21, %v1736_v52 }
 0xd33   :  { %1740 = vst [vmem:[#allocation5] sm:$0x3] %v1739_v20 }
 0xd34   :  { %2116 = shalt.err (!%p2113_p9)
}
 0xd35   :  { %s2117_s19 = scalar_lea.hbm %s2726_s16, 32 }
 0xd36   :  { %p2118_p10 = scmp.ne.s32.totalorder %s2726_s16, %s2117_s19  ;;  %p2121_p11 = scmp.lt.u32.totalorder %s2117_s19, %s2726_s16 }
 0xd38   :  { %p2123_p12 = pnand %p2121_p11, %p2118_p10 }
 0xd3a   :  { %2126 = shalt.err (!%p2123_p12)
}
 0xd3b   :  { %1754 = dma.vmem_to_hbm [thread:$0]  %s1752_s10, 32, %s2726_s16, [#allocation3]  }
 0xd3c   :  { %2129 = dma.done.wait [#allocation3], 32  }
 0xd3d   :  { %2130 = vsyncadd [#allocation3], 4294967264 }
 0xd3e   :  { %1762 = vsyncpa [#allocation3], 1 }
 0xd3f   :  { %1763 = vsyncpa [#allocation4], 1 }

</bundles_post_ra>
